<compile_context>
chip_gen: v7x
topology: tpu7x:2x2x1
jax: 0.10.0
libtpu: 0.0.40
codegen_flags: <defaults>
</compile_context>

<pallas_src>
import jax
import jax.numpy as jnp
from jax.experimental import pallas as pl
from jax.experimental.pallas import tpu as pltpu

# ---------------- problem sizes (small, consistent with the module) ---------
N_NODES = 64        # total nodes across all graphs in the batch
N_EDGES = 128       # directed edges
F_IN = 16           # dataset.num_features
HIDDEN = 32         # hidden
N_CLASSES = 8       # dataset.num_classes
N_GRAPHS = 8        # number of graphs in the batch
N_CONV = 3          # num_conv_layers
BN_EPS = 1e-5
BN_GAMMA = 1.0      # torch.nn.init.constant_(m.weight, 1)
BN_BETA = 1e-4      # torch.nn.init.constant_(m.bias, 0.0001)


def _bn_train(x):
    """BatchNorm1d, training mode, gamma=1, beta=1e-4 (biased variance).

    Statistics computed on the MXU (ones-row matmuls) instead of cross-sublane
    jnp.mean reductions, keeping the XLU off the critical path.
    """
    n = x.shape[0]                                   # static Python int
    ones_row = jnp.ones((1, n), jnp.float32)
    s = jnp.dot(ones_row, x, preferred_element_type=jnp.float32)       # sum x
    s2 = jnp.dot(ones_row, x * x, preferred_element_type=jnp.float32)  # sum x^2
    inv_n = 1.0 / n
    mean = s * inv_n
    var = jnp.maximum(s2 * inv_n - mean * mean, 0.0)  # biased variance, >= 0
    return (x - mean) * jax.lax.rsqrt(var + BN_EPS) * BN_GAMMA + BN_BETA


def ginnet_kernel(x_ref, src_ref, dst_ref, batch_ref,
                  wc_ref, bc_ref,
                  gw1_ref, gb1_ref, gw2_ref, gb2_ref,
                  wl_ref, bl_ref,
                  wcls_ref, bcls_ref,
                  out_ref):
    f32 = jnp.float32
    bf16 = jnp.bfloat16

    # ---- build adjacency on the MXU (no XLA scatter-add) -------------------
    # A[i, j] = #edges j -> i  =  sum_e [dst_e == i] * [src_e == j]
    node_iota_sub = jax.lax.broadcasted_iota(jnp.int32, (N_NODES, N_EDGES), 0)
    dst_oh_t = (node_iota_sub == dst_ref[...]).astype(bf16)              # [N, E]
    node_iota_lane = jax.lax.broadcasted_iota(jnp.int32, (N_EDGES, N_NODES), 1)
    src_oh = (node_iota_lane == src_ref[...]).astype(bf16)               # [E, N]
    a = jnp.dot(dst_oh_t, src_oh, preferred_element_type=f32)            # [N, N]

    # ---- pooling matrix P[g, i] = 1 if node i belongs to graph g -----------
    graph_iota = jax.lax.broadcasted_iota(jnp.int32, (N_GRAPHS, N_NODES), 0)
    pool = (graph_iota == batch_ref[...]).astype(f32)                    # [G, N]

    # ---- bn_feat + GCNConv(gfn=True -> plain linear) + relu ----------------
    x = _bn_train(x_ref[...])                                            # [N, F_in]
    x = jnp.dot(x, wc_ref[...], preferred_element_type=f32) + bc_ref[...]
    x = jnp.maximum(x, 0.0)                                              # [N, H]

    # ---- GIN convs: nn((1+eps)*x + sum_{j in N(i)} x_j), eps = 0 -----------
    for i in range(N_CONV):
        agg = jnp.dot(a, x, preferred_element_type=f32)                  # neighbor sum
        h = x + agg                                                      # (1+0)*x + agg
        # nn = Linear -> BatchNorm1d -> ReLU -> Linear -> ReLU
        h = jnp.dot(h, gw1_ref[i], preferred_element_type=f32) + gb1_ref[i]
        h = jnp.maximum(_bn_train(h), 0.0)
        h = jnp.dot(h, gw2_ref[i], preferred_element_type=f32) + gb2_ref[i]
        x = jnp.maximum(h, 0.0)                                          # [N, H]

    # ---- global_add_pool (MXU) ----------------------------------------------
    g = jnp.dot(pool, x, preferred_element_type=f32)                     # [G, H]

    # ---- fc stack: bns_fc[0] -> relu(lins[0]) -------------------------------
    g = _bn_train(g)
    g = jnp.dot(g, wl_ref[...], preferred_element_type=f32) + bl_ref[...]
    g = jnp.maximum(g, 0.0)

    # ---- bn_hidden (dropout=0 -> no-op) -> lin_class ------------------------
    g = _bn_train(g)
    logits = jnp.dot(g, wcls_ref[...], preferred_element_type=f32) + bcls_ref[...]

    # ---- log_softmax over classes -------------------------------------------
    m = jnp.max(logits, axis=-1, keepdims=True)
    lse = jnp.log(jnp.sum(jnp.exp(logits - m), axis=-1, keepdims=True)) + m
    out_ref[...] = logits - lse


def ginnet_forward(x, edge_index, batch, params):
    """Glue: only trivial reshapes in XLA; all heavy lifting in the kernel."""
    # Edge endpoints as 2-D int arrays (PyG flow source_to_target):
    #   src as a column [E, 1] (broadcast across lanes in-kernel),
    #   dst as a row    [1, E] (broadcast across sublanes in-kernel).
    src_col = edge_index[0].reshape(N_EDGES, 1).astype(jnp.int32)
    dst_row = edge_index[1].reshape(1, N_EDGES).astype(jnp.int32)
    batch_row = batch.reshape(1, N_NODES).astype(jnp.int32)

    args = (
        x.astype(jnp.float32), src_col, dst_row, batch_row,
        params["wc"], params["bc"],
        params["gin_w1"], params["gin_b1"], params["gin_w2"], params["gin_b2"],
        params["wl"], params["bl"],
        params["wcls"], params["bcls"],
    )

    # Rough roofline: dominated by the [N,E]x[E,N] adjacency build and
    # 3 GIN layers ([N,N]x[N,H] + 2x [N,H]x[H,H]) -> ~3 MFLOP, ~40 KiB traffic,
    # a few hundred rsqrt/exp EUP ops.
    cost = pl.CostEstimate(flops=3_000_000, transcendentals=512,
                           bytes_accessed=40_960)

    return pl.pallas_call(
        ginnet_kernel,
        out_shape=jax.ShapeDtypeStruct((N_GRAPHS, N_CLASSES), jnp.float32),
        in_specs=[pl.BlockSpec(memory_space=pltpu.MemorySpace.VMEM)] * len(args),
        out_specs=pl.BlockSpec(memory_space=pltpu.MemorySpace.VMEM),
        cost_estimate=cost,
    )(*args)


def make_params(key):
    """Deterministic parameter init (shapes from GINNet.__init__)."""
    ks = jax.random.split(key, 16)
    scale = 0.1
    p = {
        # GCNConv(gfn=True): weight [F_in, H], bias [H]
        "wc": scale * jax.random.normal(ks[0], (F_IN, HIDDEN), jnp.float32),
        "bc": scale * jax.random.normal(ks[1], (1, HIDDEN), jnp.float32),
        # 3 GIN convs, each: Linear(H,H) -> BN -> ReLU -> Linear(H,H) -> ReLU
        "gin_w1": scale * jax.random.normal(ks[2], (N_CONV, HIDDEN, HIDDEN), jnp.float32),
        "gin_b1": scale * jax.random.normal(ks[3], (N_CONV, 1, HIDDEN), jnp.float32),
        "gin_w2": scale * jax.random.normal(ks[4], (N_CONV, HIDDEN, HIDDEN), jnp.float32),
        "gin_b2": scale * jax.random.normal(ks[5], (N_CONV, 1, HIDDEN), jnp.float32),
        # lins[0]: Linear(H, H)
        "wl": scale * jax.random.normal(ks[6], (HIDDEN, HIDDEN), jnp.float32),
        "bl": scale * jax.random.normal(ks[7], (1, HIDDEN), jnp.float32),
        # lin_class: Linear(H, num_classes)
        "wcls": scale * jax.random.normal(ks[8], (HIDDEN, N_CLASSES), jnp.float32),
        "bcls": scale * jax.random.normal(ks[9], (1, N_CLASSES), jnp.float32),
    }
    return p


if __name__ == "__main__":
    key = jax.random.PRNGKey(0)
    k_x, k_e, k_p = jax.random.split(key, 3)

    # node features
    x = jax.random.normal(k_x, (N_NODES, F_IN), jnp.float32)
    # random directed edges
    edge_index = jax.random.randint(k_e, (2, N_EDGES), 0, N_NODES, jnp.int32)
    # contiguous graph assignment: 8 graphs x 8 nodes each
    batch = jnp.repeat(jnp.arange(N_GRAPHS, dtype=jnp.int32), N_NODES // N_GRAPHS)

    params = make_params(k_p)

    out = ginnet_forward(x, edge_index, batch, params)
    out = jax.block_until_ready(out)
    assert out.shape == (N_GRAPHS, N_CLASSES)
    assert bool(jnp.all(jnp.isfinite(out)))
    # log_softmax rows should sum (in prob space) to ~1
    assert bool(jnp.allclose(jnp.sum(jnp.exp(out), axis=-1), 1.0, atol=1e-4))
    print("KERNEL_OK")
</pallas_src>

<mosaic_0001>
module attributes {stable_mosaic.version = 11 : i64} {
  func.func @ginnet_kernel(%arg0: memref<64x16xf32, #tpu.memory_space<vmem>>, %arg1: memref<128x1xi32, #tpu.memory_space<vmem>>, %arg2: memref<1x128xi32, #tpu.memory_space<vmem>>, %arg3: memref<1x64xi32, #tpu.memory_space<vmem>>, %arg4: memref<16x32xf32, #tpu.memory_space<vmem>>, %arg5: memref<1x32xf32, #tpu.memory_space<vmem>>, %arg6: memref<3x32x32xf32, #tpu.memory_space<vmem>>, %arg7: memref<3x1x32xf32, #tpu.memory_space<vmem>>, %arg8: memref<3x32x32xf32, #tpu.memory_space<vmem>>, %arg9: memref<3x1x32xf32, #tpu.memory_space<vmem>>, %arg10: memref<32x32xf32, #tpu.memory_space<vmem>>, %arg11: memref<1x32xf32, #tpu.memory_space<vmem>>, %arg12: memref<32x8xf32, #tpu.memory_space<vmem>>, %arg13: memref<1x8xf32, #tpu.memory_space<vmem>>, %arg14: memref<8x8xf32, #tpu.memory_space<vmem>>) attributes {dimension_semantics = [], scalar_prefetch = 0 : i64, scratch_operands = 0 : i64, tpu.core_type = #tpu.core_type<tc>} {
    %0 = tpu.iota {dimensions = array<i32: 0>} : vector<64x128xi32>
    %c0 = arith.constant 0 : index
    %c0_0 = arith.constant 0 : index
    %1 = vector.load %arg2[%c0, %c0_0] : memref<1x128xi32, #tpu.memory_space<vmem>>, vector<1x128xi32>
    %2 = vector.broadcast %1 : vector<1x128xi32> to vector<64x128xi32>
    %3 = arith.cmpi eq, %0, %2 : vector<64x128xi32>
    %4 = arith.extui %3 : vector<64x128xi1> to vector<64x128xi32>
    %5 = arith.sitofp %4 : vector<64x128xi32> to vector<64x128xf32>
    %6 = arith.truncf %5 : vector<64x128xf32> to vector<64x128xbf16>
    %7 = tpu.iota {dimensions = array<i32: 1>} : vector<128x64xi32>
    %c0_1 = arith.constant 0 : index
    %c0_2 = arith.constant 0 : index
    %8 = vector.load %arg1[%c0_1, %c0_2] : memref<128x1xi32, #tpu.memory_space<vmem>>, vector<128x1xi32>
    %9 = vector.broadcast %8 : vector<128x1xi32> to vector<128x64xi32>
    %10 = arith.cmpi eq, %7, %9 : vector<128x64xi32>
    %11 = arith.extui %10 : vector<128x64xi1> to vector<128x64xi32>
    %12 = arith.sitofp %11 : vector<128x64xi32> to vector<128x64xf32>
    %13 = arith.truncf %12 : vector<128x64xf32> to vector<128x64xbf16>
    %cst = arith.constant dense<0.000000e+00> : vector<64x64xf32>
    %14 = tpu.matmul %6, %13, %cst {dimension_numbers = #tpu.dot_dimension_numbers<[1], [0], [0], [1], [0, 0, 1, 1], [], []>} : vector<64x128xbf16>, vector<128x64xbf16>, vector<64x64xf32> -> vector<64x64xf32>
    %15 = tpu.iota {dimensions = array<i32: 0>} : vector<8x64xi32>
    %c0_3 = arith.constant 0 : index
    %c0_4 = arith.constant 0 : index
    %16 = vector.load %arg3[%c0_3, %c0_4] : memref<1x64xi32, #tpu.memory_space<vmem>>, vector<1x64xi32>
    %17 = vector.broadcast %16 : vector<1x64xi32> to vector<8x64xi32>
    %18 = arith.cmpi eq, %15, %17 : vector<8x64xi32>
    %19 = arith.extui %18 : vector<8x64xi1> to vector<8x64xi32>
    %20 = arith.sitofp %19 : vector<8x64xi32> to vector<8x64xf32>
    %c0_5 = arith.constant 0 : index
    %c0_6 = arith.constant 0 : index
    %21 = vector.load %arg0[%c0_5, %c0_6] : memref<64x16xf32, #tpu.memory_space<vmem>>, vector<64x16xf32>
    %cst_7 = arith.constant 1.000000e+00 : f32
    %22 = vector.broadcast %cst_7 : f32 to vector<1x64xf32>
    %cst_8 = arith.constant dense<0.000000e+00> : vector<1x16xf32>
    %23 = tpu.matmul %22, %21, %cst_8 {dimension_numbers = #tpu.dot_dimension_numbers<[1], [0], [0], [1], [0, 0, 1, 1], [], []>} : vector<1x64xf32>, vector<64x16xf32>, vector<1x16xf32> -> vector<1x16xf32>
    %24 = arith.mulf %21, %21 : vector<64x16xf32>
    %cst_9 = arith.constant dense<0.000000e+00> : vector<1x16xf32>
    %25 = tpu.matmul %22, %24, %cst_9 {dimension_numbers = #tpu.dot_dimension_numbers<[1], [0], [0], [1], [0, 0, 1, 1], [], []>} : vector<1x64xf32>, vector<64x16xf32>, vector<1x16xf32> -> vector<1x16xf32>
    %cst_10 = arith.constant 1.562500e-02 : f32
    %26 = vector.broadcast %cst_10 : f32 to vector<1x16xf32>
    %27 = arith.mulf %23, %26 : vector<1x16xf32>
    %cst_11 = arith.constant 1.562500e-02 : f32
    %28 = vector.broadcast %cst_11 : f32 to vector<1x16xf32>
    %29 = arith.mulf %25, %28 : vector<1x16xf32>
    %30 = arith.mulf %27, %27 : vector<1x16xf32>
    %31 = arith.subf %29, %30 : vector<1x16xf32>
    %cst_12 = arith.constant 0.000000e+00 : f32
    %32 = vector.broadcast %cst_12 : f32 to vector<1x16xf32>
    %33 = arith.maximumf %31, %32 : vector<1x16xf32>
    %34 = vector.broadcast %27 : vector<1x16xf32> to vector<64x16xf32>
    %35 = arith.subf %21, %34 : vector<64x16xf32>
    %cst_13 = arith.constant 9.99999974E-6 : f32
    %36 = vector.broadcast %cst_13 : f32 to vector<1x16xf32>
    %37 = arith.addf %33, %36 : vector<1x16xf32>
    %38 = math.rsqrt %37 : vector<1x16xf32>
    %39 = vector.broadcast %38 : vector<1x16xf32> to vector<64x16xf32>
    %40 = arith.mulf %35, %39 : vector<64x16xf32>
    %cst_14 = arith.constant 1.000000e+00 : f32
    %41 = vector.broadcast %cst_14 : f32 to vector<64x16xf32>
    %42 = arith.mulf %40, %41 : vector<64x16xf32>
    %cst_15 = arith.constant 9.99999974E-5 : f32
    %43 = vector.broadcast %cst_15 : f32 to vector<64x16xf32>
    %44 = arith.addf %42, %43 : vector<64x16xf32>
    %c0_16 = arith.constant 0 : index
    %c0_17 = arith.constant 0 : index
    %45 = vector.load %arg4[%c0_16, %c0_17] : memref<16x32xf32, #tpu.memory_space<vmem>>, vector<16x32xf32>
    %cst_18 = arith.constant dense<0.000000e+00> : vector<64x32xf32>
    %46 = tpu.matmul %44, %45, %cst_18 {dimension_numbers = #tpu.dot_dimension_numbers<[1], [0], [0], [1], [0, 0, 1, 1], [], []>} : vector<64x16xf32>, vector<16x32xf32>, vector<64x32xf32> -> vector<64x32xf32>
    %c0_19 = arith.constant 0 : index
    %c0_20 = arith.constant 0 : index
    %47 = vector.load %arg5[%c0_19, %c0_20] : memref<1x32xf32, #tpu.memory_space<vmem>>, vector<1x32xf32>
    %48 = vector.broadcast %47 : vector<1x32xf32> to vector<64x32xf32>
    %49 = arith.addf %46, %48 : vector<64x32xf32>
    %cst_21 = arith.constant 0.000000e+00 : f32
    %50 = vector.broadcast %cst_21 : f32 to vector<64x32xf32>
    %51 = arith.maximumf %49, %50 : vector<64x32xf32>
    %cst_22 = arith.constant dense<0.000000e+00> : vector<64x32xf32>
    %52 = tpu.matmul %14, %51, %cst_22 {dimension_numbers = #tpu.dot_dimension_numbers<[1], [0], [0], [1], [0, 0, 1, 1], [], []>} : vector<64x64xf32>, vector<64x32xf32>, vector<64x32xf32> -> vector<64x32xf32>
    %53 = arith.addf %51, %52 : vector<64x32xf32>
    %c0_23 = arith.constant 0 : index
    %c0_24 = arith.constant 0 : index
    %c0_25 = arith.constant 0 : index
    %54 = vector.load %arg6[%c0_23, %c0_24, %c0_25] : memref<3x32x32xf32, #tpu.memory_space<vmem>>, vector<1x32x32xf32>
    %55 = vector.shape_cast %54 : vector<1x32x32xf32> to vector<32x32xf32>
    %cst_26 = arith.constant dense<0.000000e+00> : vector<64x32xf32>
    %56 = tpu.matmul %53, %55, %cst_26 {dimension_numbers = #tpu.dot_dimension_numbers<[1], [0], [0], [1], [0, 0, 1, 1], [], []>} : vector<64x32xf32>, vector<32x32xf32>, vector<64x32xf32> -> vector<64x32xf32>
    %c0_27 = arith.constant 0 : index
    %c0_28 = arith.constant 0 : index
    %c0_29 = arith.constant 0 : index
    %57 = vector.load %arg7[%c0_27, %c0_28, %c0_29] : memref<3x1x32xf32, #tpu.memory_space<vmem>>, vector<1x1x32xf32>
    %58 = vector.shape_cast %57 : vector<1x1x32xf32> to vector<1x32xf32>
    %59 = vector.broadcast %58 : vector<1x32xf32> to vector<64x32xf32>
    %60 = arith.addf %56, %59 : vector<64x32xf32>
    %cst_30 = arith.constant 1.000000e+00 : f32
    %61 = vector.broadcast %cst_30 : f32 to vector<1x64xf32>
    %cst_31 = arith.constant dense<0.000000e+00> : vector<1x32xf32>
    %62 = tpu.matmul %61, %60, %cst_31 {dimension_numbers = #tpu.dot_dimension_numbers<[1], [0], [0], [1], [0, 0, 1, 1], [], []>} : vector<1x64xf32>, vector<64x32xf32>, vector<1x32xf32> -> vector<1x32xf32>
    %63 = arith.mulf %60, %60 : vector<64x32xf32>
    %cst_32 = arith.constant dense<0.000000e+00> : vector<1x32xf32>
    %64 = tpu.matmul %61, %63, %cst_32 {dimension_numbers = #tpu.dot_dimension_numbers<[1], [0], [0], [1], [0, 0, 1, 1], [], []>} : vector<1x64xf32>, vector<64x32xf32>, vector<1x32xf32> -> vector<1x32xf32>
    %cst_33 = arith.constant 1.562500e-02 : f32
    %65 = vector.broadcast %cst_33 : f32 to vector<1x32xf32>
    %66 = arith.mulf %62, %65 : vector<1x32xf32>
    %cst_34 = arith.constant 1.562500e-02 : f32
    %67 = vector.broadcast %cst_34 : f32 to vector<1x32xf32>
    %68 = arith.mulf %64, %67 : vector<1x32xf32>
    %69 = arith.mulf %66, %66 : vector<1x32xf32>
    %70 = arith.subf %68, %69 : vector<1x32xf32>
    %cst_35 = arith.constant 0.000000e+00 : f32
    %71 = vector.broadcast %cst_35 : f32 to vector<1x32xf32>
    %72 = arith.maximumf %70, %71 : vector<1x32xf32>
    %73 = vector.broadcast %66 : vector<1x32xf32> to vector<64x32xf32>
    %74 = arith.subf %60, %73 : vector<64x32xf32>
    %cst_36 = arith.constant 9.99999974E-6 : f32
    %75 = vector.broadcast %cst_36 : f32 to vector<1x32xf32>
    %76 = arith.addf %72, %75 : vector<1x32xf32>
    %77 = math.rsqrt %76 : vector<1x32xf32>
    %78 = vector.broadcast %77 : vector<1x32xf32> to vector<64x32xf32>
    %79 = arith.mulf %74, %78 : vector<64x32xf32>
    %cst_37 = arith.constant 1.000000e+00 : f32
    %80 = vector.broadcast %cst_37 : f32 to vector<64x32xf32>
    %81 = arith.mulf %79, %80 : vector<64x32xf32>
    %cst_38 = arith.constant 9.99999974E-5 : f32
    %82 = vector.broadcast %cst_38 : f32 to vector<64x32xf32>
    %83 = arith.addf %81, %82 : vector<64x32xf32>
    %cst_39 = arith.constant 0.000000e+00 : f32
    %84 = vector.broadcast %cst_39 : f32 to vector<64x32xf32>
    %85 = arith.maximumf %83, %84 : vector<64x32xf32>
    %c0_40 = arith.constant 0 : index
    %c0_41 = arith.constant 0 : index
    %c0_42 = arith.constant 0 : index
    %86 = vector.load %arg8[%c0_40, %c0_41, %c0_42] : memref<3x32x32xf32, #tpu.memory_space<vmem>>, vector<1x32x32xf32>
    %87 = vector.shape_cast %86 : vector<1x32x32xf32> to vector<32x32xf32>
    %cst_43 = arith.constant dense<0.000000e+00> : vector<64x32xf32>
    %88 = tpu.matmul %85, %87, %cst_43 {dimension_numbers = #tpu.dot_dimension_numbers<[1], [0], [0], [1], [0, 0, 1, 1], [], []>} : vector<64x32xf32>, vector<32x32xf32>, vector<64x32xf32> -> vector<64x32xf32>
    %c0_44 = arith.constant 0 : index
    %c0_45 = arith.constant 0 : index
    %c0_46 = arith.constant 0 : index
    %89 = vector.load %arg9[%c0_44, %c0_45, %c0_46] : memref<3x1x32xf32, #tpu.memory_space<vmem>>, vector<1x1x32xf32>
    %90 = vector.shape_cast %89 : vector<1x1x32xf32> to vector<1x32xf32>
    %91 = vector.broadcast %90 : vector<1x32xf32> to vector<64x32xf32>
    %92 = arith.addf %88, %91 : vector<64x32xf32>
    %cst_47 = arith.constant 0.000000e+00 : f32
    %93 = vector.broadcast %cst_47 : f32 to vector<64x32xf32>
    %94 = arith.maximumf %92, %93 : vector<64x32xf32>
    %cst_48 = arith.constant dense<0.000000e+00> : vector<64x32xf32>
    %95 = tpu.matmul %14, %94, %cst_48 {dimension_numbers = #tpu.dot_dimension_numbers<[1], [0], [0], [1], [0, 0, 1, 1], [], []>} : vector<64x64xf32>, vector<64x32xf32>, vector<64x32xf32> -> vector<64x32xf32>
    %96 = arith.addf %94, %95 : vector<64x32xf32>
    %c1 = arith.constant 1 : index
    %c0_49 = arith.constant 0 : index
    %c0_50 = arith.constant 0 : index
    %97 = vector.load %arg6[%c1, %c0_49, %c0_50] : memref<3x32x32xf32, #tpu.memory_space<vmem>>, vector<1x32x32xf32>
    %98 = vector.shape_cast %97 : vector<1x32x32xf32> to vector<32x32xf32>
    %cst_51 = arith.constant dense<0.000000e+00> : vector<64x32xf32>
    %99 = tpu.matmul %96, %98, %cst_51 {dimension_numbers = #tpu.dot_dimension_numbers<[1], [0], [0], [1], [0, 0, 1, 1], [], []>} : vector<64x32xf32>, vector<32x32xf32>, vector<64x32xf32> -> vector<64x32xf32>
    %c1_52 = arith.constant 1 : index
    %c0_53 = arith.constant 0 : index
    %c0_54 = arith.constant 0 : index
    %100 = vector.load %arg7[%c1_52, %c0_53, %c0_54] : memref<3x1x32xf32, #tpu.memory_space<vmem>>, vector<1x1x32xf32>
    %101 = vector.shape_cast %100 : vector<1x1x32xf32> to vector<1x32xf32>
    %102 = vector.broadcast %101 : vector<1x32xf32> to vector<64x32xf32>
    %103 = arith.addf %99, %102 : vector<64x32xf32>
    %cst_55 = arith.constant 1.000000e+00 : f32
    %104 = vector.broadcast %cst_55 : f32 to vector<1x64xf32>
    %cst_56 = arith.constant dense<0.000000e+00> : vector<1x32xf32>
    %105 = tpu.matmul %104, %103, %cst_56 {dimension_numbers = #tpu.dot_dimension_numbers<[1], [0], [0], [1], [0, 0, 1, 1], [], []>} : vector<1x64xf32>, vector<64x32xf32>, vector<1x32xf32> -> vector<1x32xf32>
    %106 = arith.mulf %103, %103 : vector<64x32xf32>
    %cst_57 = arith.constant dense<0.000000e+00> : vector<1x32xf32>
    %107 = tpu.matmul %104, %106, %cst_57 {dimension_numbers = #tpu.dot_dimension_numbers<[1], [0], [0], [1], [0, 0, 1, 1], [], []>} : vector<1x64xf32>, vector<64x32xf32>, vector<1x32xf32> -> vector<1x32xf32>
    %cst_58 = arith.constant 1.562500e-02 : f32
    %108 = vector.broadcast %cst_58 : f32 to vector<1x32xf32>
    %109 = arith.mulf %105, %108 : vector<1x32xf32>
    %cst_59 = arith.constant 1.562500e-02 : f32
    %110 = vector.broadcast %cst_59 : f32 to vector<1x32xf32>
    %111 = arith.mulf %107, %110 : vector<1x32xf32>
    %112 = arith.mulf %109, %109 : vector<1x32xf32>
    %113 = arith.subf %111, %112 : vector<1x32xf32>
    %cst_60 = arith.constant 0.000000e+00 : f32
    %114 = vector.broadcast %cst_60 : f32 to vector<1x32xf32>
    %115 = arith.maximumf %113, %114 : vector<1x32xf32>
    %116 = vector.broadcast %109 : vector<1x32xf32> to vector<64x32xf32>
    %117 = arith.subf %103, %116 : vector<64x32xf32>
    %cst_61 = arith.constant 9.99999974E-6 : f32
    %118 = vector.broadcast %cst_61 : f32 to vector<1x32xf32>
    %119 = arith.addf %115, %118 : vector<1x32xf32>
    %120 = math.rsqrt %119 : vector<1x32xf32>
    %121 = vector.broadcast %120 : vector<1x32xf32> to vector<64x32xf32>
    %122 = arith.mulf %117, %121 : vector<64x32xf32>
    %cst_62 = arith.constant 1.000000e+00 : f32
    %123 = vector.broadcast %cst_62 : f32 to vector<64x32xf32>
    %124 = arith.mulf %122, %123 : vector<64x32xf32>
    %cst_63 = arith.constant 9.99999974E-5 : f32
    %125 = vector.broadcast %cst_63 : f32 to vector<64x32xf32>
    %126 = arith.addf %124, %125 : vector<64x32xf32>
    %cst_64 = arith.constant 0.000000e+00 : f32
    %127 = vector.broadcast %cst_64 : f32 to vector<64x32xf32>
    %128 = arith.maximumf %126, %127 : vector<64x32xf32>
    %c1_65 = arith.constant 1 : index
    %c0_66 = arith.constant 0 : index
    %c0_67 = arith.constant 0 : index
    %129 = vector.load %arg8[%c1_65, %c0_66, %c0_67] : memref<3x32x32xf32, #tpu.memory_space<vmem>>, vector<1x32x32xf32>
    %130 = vector.shape_cast %129 : vector<1x32x32xf32> to vector<32x32xf32>
    %cst_68 = arith.constant dense<0.000000e+00> : vector<64x32xf32>
    %131 = tpu.matmul %128, %130, %cst_68 {dimension_numbers = #tpu.dot_dimension_numbers<[1], [0], [0], [1], [0, 0, 1, 1], [], []>} : vector<64x32xf32>, vector<32x32xf32>, vector<64x32xf32> -> vector<64x32xf32>
    %c1_69 = arith.constant 1 : index
    %c0_70 = arith.constant 0 : index
    %c0_71 = arith.constant 0 : index
    %132 = vector.load %arg9[%c1_69, %c0_70, %c0_71] : memref<3x1x32xf32, #tpu.memory_space<vmem>>, vector<1x1x32xf32>
    %133 = vector.shape_cast %132 : vector<1x1x32xf32> to vector<1x32xf32>
    %134 = vector.broadcast %133 : vector<1x32xf32> to vector<64x32xf32>
    %135 = arith.addf %131, %134 : vector<64x32xf32>
    %cst_72 = arith.constant 0.000000e+00 : f32
    %136 = vector.broadcast %cst_72 : f32 to vector<64x32xf32>
    %137 = arith.maximumf %135, %136 : vector<64x32xf32>
    %cst_73 = arith.constant dense<0.000000e+00> : vector<64x32xf32>
    %138 = tpu.matmul %14, %137, %cst_73 {dimension_numbers = #tpu.dot_dimension_numbers<[1], [0], [0], [1], [0, 0, 1, 1], [], []>} : vector<64x64xf32>, vector<64x32xf32>, vector<64x32xf32> -> vector<64x32xf32>
    %139 = arith.addf %137, %138 : vector<64x32xf32>
    %c2 = arith.constant 2 : index
    %c0_74 = arith.constant 0 : index
    %c0_75 = arith.constant 0 : index
    %140 = vector.load %arg6[%c2, %c0_74, %c0_75] : memref<3x32x32xf32, #tpu.memory_space<vmem>>, vector<1x32x32xf32>
    %141 = vector.shape_cast %140 : vector<1x32x32xf32> to vector<32x32xf32>
    %cst_76 = arith.constant dense<0.000000e+00> : vector<64x32xf32>
    %142 = tpu.matmul %139, %141, %cst_76 {dimension_numbers = #tpu.dot_dimension_numbers<[1], [0], [0], [1], [0, 0, 1, 1], [], []>} : vector<64x32xf32>, vector<32x32xf32>, vector<64x32xf32> -> vector<64x32xf32>
    %c2_77 = arith.constant 2 : index
    %c0_78 = arith.constant 0 : index
    %c0_79 = arith.constant 0 : index
    %143 = vector.load %arg7[%c2_77, %c0_78, %c0_79] : memref<3x1x32xf32, #tpu.memory_space<vmem>>, vector<1x1x32xf32>
    %144 = vector.shape_cast %143 : vector<1x1x32xf32> to vector<1x32xf32>
    %145 = vector.broadcast %144 : vector<1x32xf32> to vector<64x32xf32>
    %146 = arith.addf %142, %145 : vector<64x32xf32>
    %cst_80 = arith.constant 1.000000e+00 : f32
    %147 = vector.broadcast %cst_80 : f32 to vector<1x64xf32>
    %cst_81 = arith.constant dense<0.000000e+00> : vector<1x32xf32>
    %148 = tpu.matmul %147, %146, %cst_81 {dimension_numbers = #tpu.dot_dimension_numbers<[1], [0], [0], [1], [0, 0, 1, 1], [], []>} : vector<1x64xf32>, vector<64x32xf32>, vector<1x32xf32> -> vector<1x32xf32>
    %149 = arith.mulf %146, %146 : vector<64x32xf32>
    %cst_82 = arith.constant dense<0.000000e+00> : vector<1x32xf32>
    %150 = tpu.matmul %147, %149, %cst_82 {dimension_numbers = #tpu.dot_dimension_numbers<[1], [0], [0], [1], [0, 0, 1, 1], [], []>} : vector<1x64xf32>, vector<64x32xf32>, vector<1x32xf32> -> vector<1x32xf32>
    %cst_83 = arith.constant 1.562500e-02 : f32
    %151 = vector.broadcast %cst_83 : f32 to vector<1x32xf32>
    %152 = arith.mulf %148, %151 : vector<1x32xf32>
    %cst_84 = arith.constant 1.562500e-02 : f32
    %153 = vector.broadcast %cst_84 : f32 to vector<1x32xf32>
    %154 = arith.mulf %150, %153 : vector<1x32xf32>
    %155 = arith.mulf %152, %152 : vector<1x32xf32>
    %156 = arith.subf %154, %155 : vector<1x32xf32>
    %cst_85 = arith.constant 0.000000e+00 : f32
    %157 = vector.broadcast %cst_85 : f32 to vector<1x32xf32>
    %158 = arith.maximumf %156, %157 : vector<1x32xf32>
    %159 = vector.broadcast %152 : vector<1x32xf32> to vector<64x32xf32>
    %160 = arith.subf %146, %159 : vector<64x32xf32>
    %cst_86 = arith.constant 9.99999974E-6 : f32
    %161 = vector.broadcast %cst_86 : f32 to vector<1x32xf32>
    %162 = arith.addf %158, %161 : vector<1x32xf32>
    %163 = math.rsqrt %162 : vector<1x32xf32>
    %164 = vector.broadcast %163 : vector<1x32xf32> to vector<64x32xf32>
    %165 = arith.mulf %160, %164 : vector<64x32xf32>
    %cst_87 = arith.constant 1.000000e+00 : f32
    %166 = vector.broadcast %cst_87 : f32 to vector<64x32xf32>
    %167 = arith.mulf %165, %166 : vector<64x32xf32>
    %cst_88 = arith.constant 9.99999974E-5 : f32
    %168 = vector.broadcast %cst_88 : f32 to vector<64x32xf32>
    %169 = arith.addf %167, %168 : vector<64x32xf32>
    %cst_89 = arith.constant 0.000000e+00 : f32
    %170 = vector.broadcast %cst_89 : f32 to vector<64x32xf32>
    %171 = arith.maximumf %169, %170 : vector<64x32xf32>
    %c2_90 = arith.constant 2 : index
    %c0_91 = arith.constant 0 : index
    %c0_92 = arith.constant 0 : index
    %172 = vector.load %arg8[%c2_90, %c0_91, %c0_92] : memref<3x32x32xf32, #tpu.memory_space<vmem>>, vector<1x32x32xf32>
    %173 = vector.shape_cast %172 : vector<1x32x32xf32> to vector<32x32xf32>
    %cst_93 = arith.constant dense<0.000000e+00> : vector<64x32xf32>
    %174 = tpu.matmul %171, %173, %cst_93 {dimension_numbers = #tpu.dot_dimension_numbers<[1], [0], [0], [1], [0, 0, 1, 1], [], []>} : vector<64x32xf32>, vector<32x32xf32>, vector<64x32xf32> -> vector<64x32xf32>
    %c2_94 = arith.constant 2 : index
    %c0_95 = arith.constant 0 : index
    %c0_96 = arith.constant 0 : index
    %175 = vector.load %arg9[%c2_94, %c0_95, %c0_96] : memref<3x1x32xf32, #tpu.memory_space<vmem>>, vector<1x1x32xf32>
    %176 = vector.shape_cast %175 : vector<1x1x32xf32> to vector<1x32xf32>
    %177 = vector.broadcast %176 : vector<1x32xf32> to vector<64x32xf32>
    %178 = arith.addf %174, %177 : vector<64x32xf32>
    %cst_97 = arith.constant 0.000000e+00 : f32
    %179 = vector.broadcast %cst_97 : f32 to vector<64x32xf32>
    %180 = arith.maximumf %178, %179 : vector<64x32xf32>
    %cst_98 = arith.constant dense<0.000000e+00> : vector<8x32xf32>
    %181 = tpu.matmul %20, %180, %cst_98 {dimension_numbers = #tpu.dot_dimension_numbers<[1], [0], [0], [1], [0, 0, 1, 1], [], []>} : vector<8x64xf32>, vector<64x32xf32>, vector<8x32xf32> -> vector<8x32xf32>
    %cst_99 = arith.constant 1.000000e+00 : f32
    %182 = vector.broadcast %cst_99 : f32 to vector<1x8xf32>
    %cst_100 = arith.constant dense<0.000000e+00> : vector<1x32xf32>
    %183 = tpu.matmul %182, %181, %cst_100 {dimension_numbers = #tpu.dot_dimension_numbers<[1], [0], [0], [1], [0, 0, 1, 1], [], []>} : vector<1x8xf32>, vector<8x32xf32>, vector<1x32xf32> -> vector<1x32xf32>
    %184 = arith.mulf %181, %181 : vector<8x32xf32>
    %cst_101 = arith.constant dense<0.000000e+00> : vector<1x32xf32>
    %185 = tpu.matmul %182, %184, %cst_101 {dimension_numbers = #tpu.dot_dimension_numbers<[1], [0], [0], [1], [0, 0, 1, 1], [], []>} : vector<1x8xf32>, vector<8x32xf32>, vector<1x32xf32> -> vector<1x32xf32>
    %cst_102 = arith.constant 1.250000e-01 : f32
    %186 = vector.broadcast %cst_102 : f32 to vector<1x32xf32>
    %187 = arith.mulf %183, %186 : vector<1x32xf32>
    %cst_103 = arith.constant 1.250000e-01 : f32
    %188 = vector.broadcast %cst_103 : f32 to vector<1x32xf32>
    %189 = arith.mulf %185, %188 : vector<1x32xf32>
    %190 = arith.mulf %187, %187 : vector<1x32xf32>
    %191 = arith.subf %189, %190 : vector<1x32xf32>
    %cst_104 = arith.constant 0.000000e+00 : f32
    %192 = vector.broadcast %cst_104 : f32 to vector<1x32xf32>
    %193 = arith.maximumf %191, %192 : vector<1x32xf32>
    %194 = vector.broadcast %187 : vector<1x32xf32> to vector<8x32xf32>
    %195 = arith.subf %181, %194 : vector<8x32xf32>
    %cst_105 = arith.constant 9.99999974E-6 : f32
    %196 = vector.broadcast %cst_105 : f32 to vector<1x32xf32>
    %197 = arith.addf %193, %196 : vector<1x32xf32>
    %198 = math.rsqrt %197 : vector<1x32xf32>
    %199 = vector.broadcast %198 : vector<1x32xf32> to vector<8x32xf32>
    %200 = arith.mulf %195, %199 : vector<8x32xf32>
    %cst_106 = arith.constant 1.000000e+00 : f32
    %201 = vector.broadcast %cst_106 : f32 to vector<8x32xf32>
    %202 = arith.mulf %200, %201 : vector<8x32xf32>
    %cst_107 = arith.constant 9.99999974E-5 : f32
    %203 = vector.broadcast %cst_107 : f32 to vector<8x32xf32>
    %204 = arith.addf %202, %203 : vector<8x32xf32>
    %c0_108 = arith.constant 0 : index
    %c0_109 = arith.constant 0 : index
    %205 = vector.load %arg10[%c0_108, %c0_109] : memref<32x32xf32, #tpu.memory_space<vmem>>, vector<32x32xf32>
    %cst_110 = arith.constant dense<0.000000e+00> : vector<8x32xf32>
    %206 = tpu.matmul %204, %205, %cst_110 {dimension_numbers = #tpu.dot_dimension_numbers<[1], [0], [0], [1], [0, 0, 1, 1], [], []>} : vector<8x32xf32>, vector<32x32xf32>, vector<8x32xf32> -> vector<8x32xf32>
    %c0_111 = arith.constant 0 : index
    %c0_112 = arith.constant 0 : index
    %207 = vector.load %arg11[%c0_111, %c0_112] : memref<1x32xf32, #tpu.memory_space<vmem>>, vector<1x32xf32>
    %208 = vector.broadcast %207 : vector<1x32xf32> to vector<8x32xf32>
    %209 = arith.addf %206, %208 : vector<8x32xf32>
    %cst_113 = arith.constant 0.000000e+00 : f32
    %210 = vector.broadcast %cst_113 : f32 to vector<8x32xf32>
    %211 = arith.maximumf %209, %210 : vector<8x32xf32>
    %cst_114 = arith.constant 1.000000e+00 : f32
    %212 = vector.broadcast %cst_114 : f32 to vector<1x8xf32>
    %cst_115 = arith.constant dense<0.000000e+00> : vector<1x32xf32>
    %213 = tpu.matmul %212, %211, %cst_115 {dimension_numbers = #tpu.dot_dimension_numbers<[1], [0], [0], [1], [0, 0, 1, 1], [], []>} : vector<1x8xf32>, vector<8x32xf32>, vector<1x32xf32> -> vector<1x32xf32>
    %214 = arith.mulf %211, %211 : vector<8x32xf32>
    %cst_116 = arith.constant dense<0.000000e+00> : vector<1x32xf32>
    %215 = tpu.matmul %212, %214, %cst_116 {dimension_numbers = #tpu.dot_dimension_numbers<[1], [0], [0], [1], [0, 0, 1, 1], [], []>} : vector<1x8xf32>, vector<8x32xf32>, vector<1x32xf32> -> vector<1x32xf32>
    %cst_117 = arith.constant 1.250000e-01 : f32
    %216 = vector.broadcast %cst_117 : f32 to vector<1x32xf32>
    %217 = arith.mulf %213, %216 : vector<1x32xf32>
    %cst_118 = arith.constant 1.250000e-01 : f32
    %218 = vector.broadcast %cst_118 : f32 to vector<1x32xf32>
    %219 = arith.mulf %215, %218 : vector<1x32xf32>
    %220 = arith.mulf %217, %217 : vector<1x32xf32>
    %221 = arith.subf %219, %220 : vector<1x32xf32>
    %cst_119 = arith.constant 0.000000e+00 : f32
    %222 = vector.broadcast %cst_119 : f32 to vector<1x32xf32>
    %223 = arith.maximumf %221, %222 : vector<1x32xf32>
    %224 = vector.broadcast %217 : vector<1x32xf32> to vector<8x32xf32>
    %225 = arith.subf %211, %224 : vector<8x32xf32>
    %cst_120 = arith.constant 9.99999974E-6 : f32
    %226 = vector.broadcast %cst_120 : f32 to vector<1x32xf32>
    %227 = arith.addf %223, %226 : vector<1x32xf32>
    %228 = math.rsqrt %227 : vector<1x32xf32>
    %229 = vector.broadcast %228 : vector<1x32xf32> to vector<8x32xf32>
    %230 = arith.mulf %225, %229 : vector<8x32xf32>
    %cst_121 = arith.constant 1.000000e+00 : f32
    %231 = vector.broadcast %cst_121 : f32 to vector<8x32xf32>
    %232 = arith.mulf %230, %231 : vector<8x32xf32>
    %cst_122 = arith.constant 9.99999974E-5 : f32
    %233 = vector.broadcast %cst_122 : f32 to vector<8x32xf32>
    %234 = arith.addf %232, %233 : vector<8x32xf32>
    %c0_123 = arith.constant 0 : index
    %c0_124 = arith.constant 0 : index
    %235 = vector.load %arg12[%c0_123, %c0_124] : memref<32x8xf32, #tpu.memory_space<vmem>>, vector<32x8xf32>
    %cst_125 = arith.constant dense<0.000000e+00> : vector<8x8xf32>
    %236 = tpu.matmul %234, %235, %cst_125 {dimension_numbers = #tpu.dot_dimension_numbers<[1], [0], [0], [1], [0, 0, 1, 1], [], []>} : vector<8x32xf32>, vector<32x8xf32>, vector<8x8xf32> -> vector<8x8xf32>
    %c0_126 = arith.constant 0 : index
    %c0_127 = arith.constant 0 : index
    %237 = vector.load %arg13[%c0_126, %c0_127] : memref<1x8xf32, #tpu.memory_space<vmem>>, vector<1x8xf32>
    %238 = vector.broadcast %237 : vector<1x8xf32> to vector<8x8xf32>
    %239 = arith.addf %236, %238 : vector<8x8xf32>
    %cst_128 = arith.constant dense<0xFF800000> : vector<8xf32>
    %240 = vector.multi_reduction <maximumf>, %239, %cst_128 [1] : vector<8x8xf32> to vector<8xf32>
    %241 = vector.shape_cast %240 : vector<8xf32> to vector<8x1xf32>
    %242 = vector.broadcast %241 : vector<8x1xf32> to vector<8x8xf32>
    %243 = arith.subf %239, %242 : vector<8x8xf32>
    %244 = math.exp %243 : vector<8x8xf32>
    %cst_129 = arith.constant dense<0.000000e+00> : vector<8xf32>
    %245 = vector.multi_reduction <add>, %244, %cst_129 [1] : vector<8x8xf32> to vector<8xf32>
    %246 = vector.shape_cast %245 : vector<8xf32> to vector<8x1xf32>
    %247 = math.log %246 : vector<8x1xf32>
    %248 = arith.addf %247, %241 : vector<8x1xf32>
    %249 = vector.broadcast %248 : vector<8x1xf32> to vector<8x8xf32>
    %250 = arith.subf %239, %249 : vector<8x8xf32>
    %c0_130 = arith.constant 0 : index
    %c0_131 = arith.constant 0 : index
    %251 = vector.load %arg14[%c0_130, %c0_131] : memref<8x8xf32, #tpu.memory_space<vmem>>, vector<8x8xf32>
    tpu.vector_store %arg14[%c0_130, %c0_131], %250 {strides = array<i32>} : memref<8x8xf32, #tpu.memory_space<vmem>>, vector<8x8xf32>,
    return
  }
}

</mosaic_0001>

<bundles_post_ra>
// kernel: tpu_custom_call.1
= control target key start
LH: loop header
LB: loop body
LE: loop exit
PB: predicated region body
PF: predicated region fallthrough
CT: control target
= control target key end

     0   :  { %v4186_v3 = vmov 0.0|0.0   ;;  %vm4187_vm0 = vmmov 0   ;;  %v4188_v6 = vmov 0.0   ;;  %v4189_v12 = vmov 0   ;;  %s4932_s0 = inlined_call_operand.vmem [shape: f32[64,16], index: 0, kind: input, shape index: {}]   ;;  %s4933_s1 = inlined_call_operand.vmem [shape: s32[128,1], index: 1, kind: input, shape index: {}]   ;;  %s4934_s2 = inlined_call_operand.vmem [shape: s32[1,128], index: 2, kind: input, shape index: {}]   ;;  %s4935_s3 = inlined_call_operand.vmem [shape: s32[1,64], index: 3, kind: input, shape index: {}]   ;;  %s4936_s4 = inlined_call_operand.vmem [shape: f32[16,32], index: 4, kind: input, shape index: {}]   ;;  %s4937_s5 = inlined_call_operand.vmem [shape: f32[1,32], index: 5, kind: input, shape index: {}]   ;;  %s4938_s6 = inlined_call_operand.vmem [shape: f32[3,32,32], index: 6, kind: input, shape index: {}]   ;;  %s4939_s7 = inlined_call_operand.vmem [shape: f32[3,1,32], index: 7, kind: input, shape index: {}]   ;;  %s4940_s8 = inlined_call_operand.vmem [shape: f32[3,32,32], index: 8, kind: input, shape index: {}]   ;;  %s4941_s9 = inlined_call_operand.vmem [shape: f32[3,1,32], index: 9, kind: input, shape index: {}]   ;;  %s4942_s10 = inlined_call_operand.vmem [shape: f32[32,32], index: 10, kind: input, shape index: {}]   ;;  %s4943_s11 = inlined_call_operand.vmem [shape: f32[1,32], index: 11, kind: input, shape index: {}]   ;;  %s4944_s12 = inlined_call_operand.vmem [shape: f32[32,8], index: 12, kind: input, shape index: {}]   ;;  %s4945_s13 = inlined_call_operand.vmem [shape: f32[1,8], index: 13, kind: input, shape index: {}]   ;;  %s4946_s14 = inlined_call_operand.hbm [shape: f32[8,8], index: 14, kind: output, shape index: {}]  }
   0x1   :  { %v4271_v0 = vld [vmem:[%s4932_s0] sm:$0xff]  ;;  %v4276_v1 = vld [vmem:[%s4932_s0 + $0x8] sm:$0xff]  ;;  %v4281_v2 = vld [vmem:[%s4932_s0 + $0x10] sm:$0xff]  ;;  %3917 = vmatprep.subr.bf16.mxu1 %v4186_v3  ;;  %3500 = vmatprep.mubr.msk.f32.mxu1 %vm4187_vm0, %v4188_v6 }
   0x2   :  { %v3918_v4 = vpack.c.bf16 %v4276_v1, %v4271_v0  ;;  %v4289_v5 = vld [vmem:[%s4932_s0 + $0x18] sm:$0xff]  ;;  %v4299_v8 = vld [vmem:[%s4932_s0 + $0x20] sm:$0xff]  ;;  %v4304_v9 = vld [vmem:[%s4932_s0 + $0x28] sm:$0xff]  ;;  %4144 = vset.pattern.permute.xlu0 %v4189_v12  ;;  %4145 = vset.pattern.permute.xlu1 %v4189_v12 }
   0x3   :  { %v3921_v7 = vpack.c.bf16 %v4289_v5, %v4281_v2  ;;  %v93_v10 = vld [vmem:[%s4933_s1] sm:$0xff]  ;;  %v95_v11 = vld [vmem:[%s4933_s1 + $0x10] sm:$0xff]  ;;  %v3924_v13 = vpack.c.bf16 %v4304_v9, %v4299_v8  ;;  %v4323_v15 = vld [vmem:[%s4932_s0 + $0x38] sm:$0xff] }
   0x4   :  { %3919 = vmatpush3.bf16.msra.mxu1 %v3918_v4  ;;  %v4317_v14 = vld [vmem:[%s4932_s0 + $0x30] sm:$0xff]  ;;  %110 = vperm.xlu0 %4144, %v93_v10   ;;  %v94_v16 = vld [vmem:[%s4933_s1 + $0x8] sm:$0xff] }
   0x5   :  { %3920 = vmatprep.subr.bf16.mxu1 %v4186_v3  ;;  %116 = vperm.xlu1 %4145, %v95_v11  }
   0x8   :  { %3922 = vmatpush3.bf16.msra.mxu1 %v3921_v7 }
   0x9   :  { %3923 = vmatprep.subr.bf16.mxu1 %v4186_v3 }
   0xa   :  { %19 = vsyncpa [#allocation3], 0  ;;  %v96_v17 = vld [vmem:[%s4933_s1 + $0x18] sm:$0xff]  ;;  %v368_v18 = vmul.f32 %v4271_v0, %v4271_v0  ;;  %v369_v19 = vmul.f32 %v4276_v1, %v4276_v1  ;;  %v3927_v20 = vpack.c.bf16 %v4323_v15, %v4317_v14  ;;  %113 = vperm.xlu0 %4144, %v94_v16   ;;  %v97_v21 = vld [vmem:[%s4933_s1 + $0x20] sm:$0xff]  ;;  %v370_v23 = vmul.f32 %v4281_v2, %v4281_v2  ;;  %s4192_s23 = smov [#allocation2]  }
   0xb   :  { %119 = vperm.xlu1 %4145, %v96_v17   ;;  %v98_v22 = vld [vmem:[%s4933_s1 + $0x28] sm:$0xff]  ;;  %v371_v24 = vmul.f32 %v4289_v5, %v4289_v5  ;;  %vm294_vm1 = vcmask 523264   ;;  %v100_v26 = vld [vmem:[%s4933_s1 + $0x38] sm:$0xff]  ;;  %v4190_v27 = vmov 1.0   ;;  %v99_v28 = vld [vmem:[%s4933_s1 + $0x30] sm:$0xff]  ;;  %v372_v29 = vmul.f32 %v4299_v8, %v4299_v8 }
   0xc   :  { %3925 = vmatpush3.bf16.msra.mxu1 %v3924_v13  ;;  %v3930_v25 = vpack.c.bf16 %v369_v19, %v368_v18  ;;  %v373_v30 = vmul.f32 %v4304_v9, %v4304_v9  ;;  %v102_v32 = vld [vmem:[%s4933_s1 + $0x48] sm:$0xff]  ;;  %v101_v33 = vld [vmem:[%s4933_s1 + $0x40] sm:$0xff]  ;;  %v374_v34 = vmul.f32 %v4317_v14, %v4317_v14  ;;  %v375_v35 = vmul.f32 %v4323_v15, %v4323_v15  ;;  %v104_v37 = vld [vmem:[%s4933_s1 + $0x58] sm:$0xff] }
   0xd   :  { %3926 = vmatprep.subr.bf16.mxu1 %v4186_v3  ;;  %v3933_v31 = vpack.c.bf16 %v371_v24, %v370_v23  ;;  %v103_v38 = vld [vmem:[%s4933_s1 + $0x50] sm:$0xff]  ;;  %v106_v40 = vld [vmem:[%s4933_s1 + $0x68] sm:$0xff]  ;;  %v105_v41 = vld [vmem:[%s4933_s1 + $0x60] sm:$0xff]  ;;  %v49_v44 = vlaneseq  ;;  %v4191_v53 = vmov 1.0|1.0  }
   0xe   :  { %122 = vperm.xlu0 %4144, %v97_v21   ;;  %v3936_v36 = vpack.c.bf16 %v373_v30, %v372_v29  ;;  %v3939_v39 = vpack.c.bf16 %v375_v35, %v374_v34  ;;  %v108_v42 = vld [vmem:[%s4933_s1 + $0x78] sm:$0xff]  ;;  %v107_v43 = vld [vmem:[%s4933_s1 + $0x70] sm:$0xff]  ;;  %v485_v48 = vld [vmem:[%s4936_s4] sm:$0xff] }
   0xf   :  { %125 = vperm.xlu1 %4145, %v98_v22   ;;  %v4396_v45 = vand.u32 127, %v49_v44  ;;  %v486_v49 = vld [vmem:[%s4936_s4 + $0x8] sm:$0xff]  ;;  %v4421_v60 = vshrl.u32 %v49_v44, 7  ;;  %v3044_v4 = vld [vmem:[%s4934_s2] ss:$0 sm:$0xff] }
  0x10   :  { %3928 = vmatpush3.bf16.msra.mxu1 %v3927_v20  ;;  %v3941_v51 = vpack.c.bf16 %v486_v49, %v485_v48 }
  0x11   :  { %3929 = vmatprep.subr.bf16.mxu1 %v4186_v3  ;;  %v51_v63 = vadd.s32 8, %v4421_v60  ;;  %v52_v12 = vadd.s32 16, %v4421_v60  ;;  %v53_v13 = vadd.s32 24, %v4421_v60  ;;  %v54_v17 = vadd.s32 32, %v4421_v60 }
  0x12   :  { %128 = vperm.xlu0 %4144, %v99_v28   ;;  %v55_v18 = vadd.s32 40, %v4421_v60  ;;  %v56_v19 = vadd.s32 48, %v4421_v60  ;;  %v57_v20 = vadd.s32 56, %v4421_v60 }
  0x13   :  { %3501 = vmatmul.mubr.msk.f32.vlgmr.msra.gmra.mrb[0].mxu1 %vm294_vm1, %v4190_v27  ;;  %131 = vperm.xlu1 %4145, %v100_v26  }
  0x14   :  { %3931 = vmatpush3.bf16.msra.mxu1 %v3930_v25  ;;  %3519 = vmatprep.mubr.msk.f32.mxu1 %vm4187_vm0, %v4188_v6 }
  0x15   :  { %3932 = vmatprep.subr.bf16.mxu1 %v4186_v3 }
  0x16   :  { %134 = vperm.xlu0 %4144, %v101_v33  }
  0x17   :  { %137 = vperm.xlu1 %4145, %v102_v32   ;;  %v4454_v32 = vsub.s32 0, %v4421_v60 }
  0x18   :  { %3934 = vmatpush3.bf16.msra.mxu1 %v3933_v31 }
  0x19   :  { %3935 = vmatprep.subr.bf16.mxu1 %v4186_v3 }
  0x1a   :  { %140 = vperm.xlu0 %4144, %v103_v38  }
  0x1b   :  { %143 = vperm.xlu1 %4145, %v104_v37  }
  0x1c   :  { %3937 = vmatpush3.bf16.msra.mxu1 %v3936_v36 }
  0x1d   :  { %3938 = vmatprep.subr.bf16.mxu1 %v4186_v3 }
  0x1e   :  { %146 = vperm.xlu0 %4144, %v105_v41  }
  0x1f   :  { %149 = vperm.xlu1 %4145, %v106_v40  }
  0x20   :  { %3940 = vmatpush3.bf16.msra.mxu1 %v3939_v39 }
  0x21   :  { %3942 = vmatprep.subr.bf16.mxu1 %v3941_v51 }
  0x22   :  { %152 = vperm.xlu0 %4144, %v107_v43  }
  0x23   :  { %3520 = vmatmul.mubr.msk.f32.vlgmr.msra.gmra.mrb[2].mxu1 %vm294_vm1, %v4190_v27  ;;  %155 = vperm.xlu1 %4145, %v108_v42  }
  0x24   :  { %3944 = vmatpush3.bf16.msra.mxu1 %v3941_v51 }
  0x83   :  { %v111_v46 = vpop.permute.xlu0 %110 }
  0x84   :  { %v117_v47 = vpop.permute.xlu1 %116  ;;  %vm157_vm2 = vcmp.eq.s32.totalorder %v4396_v45, %v111_v46 }
  0x85   :  { %vm159_vm3 = vcmp.eq.s32.totalorder %v4396_v45, %v117_v47 }
  0x89   :  { %v114_v50 = vpop.permute.xlu0 %113 }
  0x8a   :  { %vm158_vm4 = vcmp.eq.s32.totalorder %v4396_v45, %v114_v50  ;;  %v120_v52 = vpop.permute.xlu1 %119 }
  0x8b   :  { %vm3069_vm5 = vmpackc.low %vm158_vm4, %vm157_vm2  ;;  %vm160_vm6 = vcmp.eq.s32.totalorder %v4396_v45, %v120_v52 }
  0x8c   :  { %3460 = vmatprep.subr.msk.bf16.mxu0 %vm3069_vm5, %v4191_v53  ;;  %vm3071_vm7 = vmpackc.low %vm160_vm6, %vm159_vm3 }
  0x8d   :  { %3461 = vmatpush3.bf16.msk.msra.mxu0 %vm3069_vm5, %v4191_v53  ;;  %v123_v54 = vpop.permute.xlu0 %122  ;;  %vm63_vm5 = vcmp.eq.s32.totalorder %v4421_v60, %v3044_v4 }
  0x8e   :  { %3462 = vmatprep.subr.msk.bf16.mxu0 %vm3071_vm7, %v4191_v53  ;;  %v126_v55 = vpop.permute.xlu1 %125  ;;  %vm161_vm8 = vcmp.eq.s32.totalorder %v4396_v45, %v123_v54 }
  0x8f   :  { %vm162_vm9 = vcmp.eq.s32.totalorder %v4396_v45, %v126_v55 }
  0x90   :  { %vm3073_vm10 = vmpackc.low %vm162_vm9, %vm161_vm8 }
  0x91   :  { %3463 = vmatpush3.bf16.msk.msra.mxu0 %vm3071_vm7, %v4191_v53  ;;  %v129_v57 = vpop.permute.xlu0 %128  ;;  %vm64_vm7 = vcmp.eq.s32.totalorder %v51_v63, %v3044_v4 }
  0x92   :  { %3464 = vmatprep.subr.msk.bf16.mxu0 %vm3073_vm10, %v4191_v53  ;;  %v132_v56 = vpop.permute.xlu1 %131  ;;  %vm163_vm12 = vcmp.eq.s32.totalorder %v4396_v45, %v129_v57  ;;  %vm3085_vm8 = vmpackc.low %vm64_vm7, %vm63_vm5  ;;  %vm69_vm7 = vcmp.eq.s32.totalorder %v56_v19, %v3044_v4  ;;  %v770_v57 = vld [vmem:[%s4938_s6 + $0x8] sm:$0xff] }
  0x93   :  { %vm164_vm11 = vcmp.eq.s32.totalorder %v4396_v45, %v132_v56  ;;  %3476 = vmatprep.mubr.msk.bf16.mxu0 %vm3085_vm8, %v4191_v53  ;;  %vm70_vm8 = vcmp.eq.s32.totalorder %v57_v20, %v3044_v4  ;;  %v769_v56 = vld [vmem:[%s4938_s6] sm:$0xff] }
  0x94   :  { %vm3075_vm13 = vmpackc.low %vm164_vm11, %vm163_vm12 }
  0x95   :  { %3465 = vmatpush3.bf16.msk.msra.mxu0 %vm3073_vm10, %v4191_v53  ;;  %v135_v59 = vpop.permute.xlu0 %134 }
  0x96   :  { %3466 = vmatprep.subr.msk.bf16.mxu0 %vm3075_vm13, %v4191_v53  ;;  %v138_v58 = vpop.permute.xlu1 %137  ;;  %vm165_vm15 = vcmp.eq.s32.totalorder %v4396_v45, %v135_v59 }
  0x97   :  { %vm166_vm14 = vcmp.eq.s32.totalorder %v4396_v45, %v138_v58  ;;  %v771_v58 = vld [vmem:[%s4938_s6 + $0x10] sm:$0xff] }
  0x98   :  { %vm3077_vm2 = vmpackc.low %vm166_vm14, %vm165_vm15  ;;  %vm65_vm15 = vcmp.eq.s32.totalorder %v52_v12, %v3044_v4 }
  0x99   :  { %3467 = vmatpush3.bf16.msk.msra.mxu0 %vm3075_vm13, %v4191_v53  ;;  %v141_v62 = vpop.permute.xlu0 %140 }
  0x9a   :  { %3468 = vmatprep.subr.msk.bf16.mxu0 %vm3077_vm2, %v4191_v53  ;;  %v144_v61 = vpop.permute.xlu1 %143  ;;  %vm167_vm4 = vcmp.eq.s32.totalorder %v4396_v45, %v141_v62  ;;  %v772_v62 = vld [vmem:[%s4938_s6 + $0x18] sm:$0xff] }
  0x9b   :  { %vm168_vm3 = vcmp.eq.s32.totalorder %v4396_v45, %v144_v61  ;;  %v3961_v61 = vpack.c.bf16 %v770_v57, %v769_v56  ;;  %v3114_v56 = vld [vmem:[%s4939_s7] ss:$0 sm:$0xff] }
  0x9c   :  { %vm3079_vm6 = vmpackc.low %vm168_vm3, %vm167_vm4  ;;  %vm67_vm3 = vcmp.eq.s32.totalorder %v54_v17, %v3044_v4  ;;  %vm68_vm4 = vcmp.eq.s32.totalorder %v55_v18, %v3044_v4 }
  0x9d   :  { %3469 = vmatpush3.bf16.msk.msra.mxu0 %vm3077_vm2, %v4191_v53  ;;  %v147_v10 = vpop.permute.xlu0 %146  ;;  %vm66_vm2 = vcmp.eq.s32.totalorder %v53_v13, %v3044_v4  ;;  %v3965_v4 = vpack.c.bf16 %v772_v62, %v771_v58  ;;  %3962 = vmatprep.subr.bf16.mxu1 %v3961_v61 }
  0x9e   :  { %3470 = vmatprep.subr.msk.bf16.mxu0 %vm3079_vm6, %v4191_v53  ;;  %v150_v7 = vpop.permute.xlu1 %149  ;;  %vm169_vm10 = vcmp.eq.s32.totalorder %v4396_v45, %v147_v10  ;;  %vm3087_vm5 = vmpackc.low %vm66_vm2, %vm65_vm15 }
  0x9f   :  { %vm170_vm9 = vcmp.eq.s32.totalorder %v4396_v45, %v150_v7 }
  0xa0   :  { %vm3081_vm11 = vmpackc.low %vm170_vm9, %vm169_vm10  ;;  %vm494_vm10 = vcmask 130048  }
  0xa1   :  { %3471 = vmatpush3.bf16.msk.msra.mxu0 %vm3079_vm6, %v4191_v53  ;;  %v153_v16 = vpop.permute.xlu0 %152  ;;  %vm3089_vm6 = vmpackc.low %vm68_vm4, %vm67_vm3 }
  0xa2   :  { %3472 = vmatprep.subr.msk.bf16.mxu0 %vm3081_vm11, %v4191_v53  ;;  %v156_v11 = vpop.permute.xlu1 %155  ;;  %vm171_vm13 = vcmp.eq.s32.totalorder %v4396_v45, %v153_v16  ;;  %vm3091_vm9 = vmpackc.low %vm70_vm8, %vm69_vm7 }
  0xa3   :  { %vm172_vm12 = vcmp.eq.s32.totalorder %v4396_v45, %v156_v11  ;;  %v3097_v11 = vld [vmem:[%s4937_s5] ss:$0 sm:$0xff] }
  0xa4   :  { %vm3083_vm14 = vmpackc.low %vm172_vm12, %vm171_vm13  ;;  %vm2526_vm13 = vcmask 64512  }
  0xa5   :  { %3473 = vmatpush3.bf16.msk.msra.mxu0 %vm3081_vm11, %v4191_v53  ;;  %vm780_vm11 = vcmask 261120  }
  0xa6   :  { %3474 = vmatprep.subr.msk.bf16.mxu0 %vm3083_vm14, %v4191_v53 }
  0xa9   :  { %3475 = vmatpush3.bf16.msk.msra.mxu0 %vm3083_vm14, %v4191_v53 }
  0xac   :  { %3477 = vmatmul.mubr.msk.bf16.vlgmr.msra.gmra.mrb[0].mxu0 %vm3087_vm5, %v4191_v53 }
  0xad   :  { %3480 = vmatprep.mubr.msk.bf16.mxu0 %vm3089_vm6, %v4191_v53 }
  0xb4   :  { %3481 = vmatmul.mubr.msk.bf16.gmra.mrb[4].mxu0 %vm3091_vm9, %v4191_v53 }
  0xe6   :  { %v364_v21 = vpop.f32.mrb[0].mxu1 }
  0xe7   :  { %v3502_v22 = vpop.f32.mrb[1].mxu1  ;;  %v446_v23 = vmul.f32 0.015625, %v364_v21 }
  0xe9   :  { %v448_v25 = vmul.f32 %v446_v23, %v446_v23  ;;  %v454_v33 = vrot.slane %v446_v23, %v4454_v32 }
  0xeb   :  { %v455_v35 = vsub.f32 %v4271_v0, %v454_v33  ;;  %v456_v37 = vsub.f32 %v4276_v1, %v454_v33  ;;  %v457_v38 = vsub.f32 %v4281_v2, %v454_v33  ;;  %v458_v39 = vsub.f32 %v4289_v5, %v454_v33 }
  0xec   :  { %v459_v40 = vsub.f32 %v4299_v8, %v454_v33  ;;  %v460_v41 = vsub.f32 %v4304_v9, %v454_v33  ;;  %v461_v42 = vsub.f32 %v4317_v14, %v454_v33  ;;  %v462_v43 = vsub.f32 %v4323_v15, %v454_v33 }
  0xf6   :  { %v442_v24 = vpop.f32.mrb[2].mxu1 }
  0xf7   :  { %v447_v26 = vmul.f32 0.015625, %v442_v24  ;;  %v3521_v28 = vpop.f32.mrb[3].mxu1 }
  0xf9   :  { %v449_v29 = vsub.f32 %v447_v26, %v448_v25 }
  0xfb   :  { %v450_v30 = vmax.f32 %v449_v29, 0.0 }
  0xfd   :  { %v463_v31 = vadd.f32 1e-05, %v450_v30 }
  0xff   :  { %4146 = vrsqrt.f32 %v463_v31 }
 0x109   :  { %v4147_v34 = vpop.eup %4146 }
 0x10a   :  { %v468_v36 = vrot.slane %v4147_v34, %v4454_v32 }
 0x10c   :  { %v469_v44 = vmul.f32 %v468_v36, %v455_v35  ;;  %v470_v45 = vmul.f32 %v468_v36, %v456_v37  ;;  %v471_v0 = vmul.f32 %v468_v36, %v457_v38  ;;  %v472_v46 = vmul.f32 %v468_v36, %v458_v39 }
 0x10d   :  { %v473_v47 = vmul.f32 %v468_v36, %v459_v40  ;;  %v474_v48 = vmul.f32 %v468_v36, %v460_v41  ;;  %v475_v49 = vmul.f32 %v468_v36, %v461_v42  ;;  %v476_v1 = vmul.f32 %v468_v36, %v462_v43 }
 0x10e   :  { %v477_v50 = vadd.f32 0.0001, %v469_v44  ;;  %v478_v2 = vadd.f32 0.0001, %v470_v45  ;;  %v479_v5 = vadd.f32 0.0001, %v471_v0 }
 0x10f   :  { %v480_v8 = vadd.f32 0.0001, %v472_v46  ;;  %v481_v9 = vadd.f32 0.0001, %v473_v47  ;;  %v482_v14 = vadd.f32 0.0001, %v474_v48 }
 0x110   :  { %3526 = vmatprep.mubr.msk.f32.mxu1 %vm494_vm10, %v477_v50  ;;  %v483_v15 = vadd.f32 0.0001, %v475_v49  ;;  %v484_v51 = vadd.f32 0.0001, %v476_v1 }
 0x111   :  { %3527 = vmatmul.mubr.msk.f32.vlgmr.msra.gmra.mrb[4].mxu1 %vm494_vm10, %v478_v2 }
 0x112   :  { %3529 = vmatprep.mubr.msk.f32.mxu1 %vm494_vm10, %v479_v5  ;;  %3964 = vmatpush3.bf16.msra.mxu1 %v3961_v61 }
 0x113   :  { %3966 = vmatprep.subr.bf16.mxu1 %v3965_v4 }
 0x115   :  { %3530 = vmatmul.mubr.msk.f32.gmra.mrb[6].mxu1 %vm494_vm10, %v480_v8 }
 0x116   :  { %3532 = vmatprep.mubr.msk.f32.mxu1 %vm494_vm10, %v481_v9  ;;  %3968 = vmatpush3.bf16.msra.mxu1 %v3965_v4 }
 0x117   :  { %3981 = vmatprep.subr.bf16.mxu1 %v4186_v3 }
 0x119   :  { %3533 = vmatmul.mubr.msk.f32.gmra.mrb[8].mxu1 %vm494_vm10, %v482_v14 }
 0x11a   :  { %3535 = vmatprep.mubr.msk.f32.mxu1 %vm494_vm10, %v483_v15 }
 0x11d   :  { %3536 = vmatmul.mubr.msk.f32.gmra.mrb[10].mxu1 %vm494_vm10, %v484_v51 }
 0x17f   :  { %v4474_v52 = vpop.f32.mrb[0].mxu0 }
 0x180   :  { %v4476_v53 = vpop.f32.mrb[1].mxu0 }
 0x181   :  { %v4478_v54 = vpop.f32.mrb[2].mxu0  ;;  %3554 = vmatprep.mubr.msk.f32.mxu0 %vm294_vm1, %v4476_v53 }
 0x182   :  { %v4482_v55 = vpop.f32.mrb[3].mxu0 }
 0x187   :  { %v4493_v59 = vpop.f32.mrb[4].mxu0 }
 0x188   :  { %v4498_v63 = vpop.f32.mrb[5].mxu0 }
 0x189   :  { %v4500_v7 = vpop.f32.mrb[6].mxu0 }
 0x18a   :  { %v4502_v10 = vpop.f32.mrb[7].mxu0 }
 0x1e4   :  { %v3528_v12 = vpop.f32.mrb[4].mxu1 }
 0x1e5   :  { %v591_v13 = vadd.f32 %v3528_v12, %v3097_v11  ;;  %v585_v16 = vpop.f32.mrb[5].mxu1 }
 0x1e6   :  { %v586_v17 = vadd.f32 %v3097_v11, %v585_v16 }
 0x1e7   :  { %v625_v18 = vmax.f32 %v591_v13, 0.0 }
 0x1e8   :  { %v624_v19 = vmax.f32 %v586_v17, 0.0  ;;  %v3531_v20 = vpop.f32.mrb[6].mxu1 }
 0x1e9   :  { %v601_v21 = vadd.f32 %v3531_v20, %v3097_v11  ;;  %v595_v22 = vpop.f32.mrb[7].mxu1 }
 0x1ea   :  { %v3945_v23 = vpack.c.bf16 %v625_v18, %v624_v19  ;;  %v596_v24 = vadd.f32 %v3097_v11, %v595_v22 }
 0x1eb   :  { %v627_v25 = vmax.f32 %v601_v21, 0.0 }
 0x1ec   :  { %v626_v26 = vmax.f32 %v596_v24, 0.0  ;;  %v3534_v28 = vpop.f32.mrb[8].mxu1  ;;  %3946 = vmatprep.subr.bf16.mxu0 %v3945_v23 }
 0x1ed   :  { %v611_v29 = vadd.f32 %v3534_v28, %v3097_v11  ;;  %v605_v30 = vpop.f32.mrb[9].mxu1  ;;  %3948 = vmatpush3.bf16.msra.mxu0 %v3945_v23 }
 0x1ee   :  { %v3949_v31 = vpack.c.bf16 %v627_v25, %v626_v26  ;;  %v606_v33 = vadd.f32 %v3097_v11, %v605_v30 }
 0x1ef   :  { %v629_v34 = vmax.f32 %v611_v29, 0.0 }
 0x1f0   :  { %v628_v35 = vmax.f32 %v606_v33, 0.0  ;;  %v3537_v36 = vpop.f32.mrb[10].mxu1  ;;  %3950 = vmatprep.subr.bf16.mxu0 %v3949_v31 }
 0x1f1   :  { %v621_v37 = vadd.f32 %v3537_v36, %v3097_v11  ;;  %v615_v38 = vpop.f32.mrb[11].mxu1  ;;  %3952 = vmatpush3.bf16.msra.mxu0 %v3949_v31 }
 0x1f2   :  { %v3953_v39 = vpack.c.bf16 %v629_v34, %v628_v35  ;;  %v616_v40 = vadd.f32 %v3097_v11, %v615_v38 }
 0x1f3   :  { %v631_v41 = vmax.f32 %v621_v37, 0.0 }
 0x1f4   :  { %v630_v42 = vmax.f32 %v616_v40, 0.0  ;;  %3954 = vmatprep.subr.bf16.mxu0 %v3953_v39 }
 0x1f5   :  { %3956 = vmatpush3.bf16.msra.mxu0 %v3953_v39 }
 0x1f6   :  { %v3957_v43 = vpack.c.bf16 %v631_v41, %v630_v42 }
 0x1f8   :  { %3958 = vmatprep.subr.bf16.mxu0 %v3957_v43 }
 0x1f9   :  { %3960 = vmatpush3.bf16.msra.mxu0 %v3957_v43  ;;  %v1106_v43 = vld [vmem:[%s4940_s8 + $0x8] sm:$0xff] }
 0x1fa   :  { %3969 = vmatprep.subr.bf16.mxu0 %v4186_v3 }
 0x1fc   :  { %3555 = vmatmul.mubr.msk.f32.vlgmr.msra.gmra.mrb[8].mxu0 %vm294_vm1, %v4482_v55 }
 0x1fd   :  { %3557 = vmatprep.mubr.msk.f32.mxu0 %vm294_vm1, %v4474_v52 }
 0x200   :  { %3558 = vmatmul.mubr.msk.f32.gmra.mrb[10].mxu0 %vm294_vm1, %v4478_v54 }
 0x201   :  { %3560 = vmatprep.mubr.msk.f32.mxu0 %vm294_vm1, %v4498_v63 }
 0x204   :  { %3561 = vmatmul.mubr.msk.f32.gmra.mrb[12].mxu0 %vm294_vm1, %v4502_v10 }
 0x205   :  { %3563 = vmatprep.mubr.msk.f32.mxu0 %vm294_vm1, %v4493_v59 }
 0x208   :  { %3564 = vmatmul.mubr.msk.f32.gmra.mrb[14].mxu0 %vm294_vm1, %v4500_v7 }
 0x209   :  { %3602 = vmatprep.mubr.msk.f32.mxu0 %vm4187_vm0, %v4188_v6 }
 0x2cf   :  { %v3556_v44 = vpop.f32.mrb[8].mxu0 }
 0x2d0   :  { %v722_v45 = vpop.f32.mrb[9].mxu0  ;;  %v762_v46 = vadd.f32 %v3556_v44, %v625_v18  ;;  %v1107_v44 = vld [vmem:[%s4940_s8 + $0x10] sm:$0xff] }
 0x2d1   :  { %v761_v0 = vadd.f32 %v722_v45, %v624_v19 }
 0x2d3   :  { %v3559_v47 = vpop.f32.mrb[10].mxu0  ;;  %3574 = vmatprep.mubr.msk.f32.mxu1 %vm780_vm11, %v761_v0  ;;  %v1108_v0 = vld [vmem:[%s4940_s8 + $0x18] sm:$0xff] }
 0x2d4   :  { %v732_v48 = vpop.f32.mrb[11].mxu0  ;;  %3575 = vmatmul.mubr.msk.f32.vlgmr.msra.gmra.mrb[12].mxu1 %vm780_vm11, %v762_v46  ;;  %v764_v1 = vadd.f32 %v3559_v47, %v627_v25  ;;  %v3997_v46 = vpack.c.bf16 %v1108_v0, %v1107_v44  ;;  %v3144_v44 = vld [vmem:[%s4938_s6 + $0x30] sm:$0xff]  ;;  %v3145_v0 = vld [vmem:[%s4938_s6 + $0x38] sm:$0xff] }
 0x2d5   :  { %v763_v49 = vadd.f32 %v732_v48, %v626_v26 }
 0x2d7   :  { %v3562_v50 = vpop.f32.mrb[12].mxu0  ;;  %3577 = vmatprep.mubr.msk.f32.mxu1 %vm780_vm11, %v763_v49 }
 0x2d8   :  { %v742_v2 = vpop.f32.mrb[13].mxu0  ;;  %3578 = vmatmul.mubr.msk.f32.gmra.mrb[14].mxu1 %vm780_vm11, %v764_v1  ;;  %v766_v8 = vadd.f32 %v3562_v50, %v629_v34 }
 0x2d9   :  { %v765_v5 = vadd.f32 %v742_v2, %v628_v35 }
 0x2db   :  { %v3565_v9 = vpop.f32.mrb[14].mxu0  ;;  %3580 = vmatprep.mubr.msk.f32.mxu1 %vm780_vm11, %v765_v5 }
 0x2dc   :  { %v752_v14 = vpop.f32.mrb[15].mxu0  ;;  %3581 = vmatmul.mubr.msk.f32.gmra.mrb[16].mxu1 %vm780_vm11, %v766_v8  ;;  %v768_v51 = vadd.f32 %v3565_v9, %v631_v41 }
 0x2dd   :  { %v767_v15 = vadd.f32 %v752_v14, %v630_v42  ;;  %v1105_v42 = vld [vmem:[%s4940_s8] sm:$0xff] }
 0x2de   :  { %v3993_v45 = vpack.c.bf16 %v1106_v43, %v1105_v42  ;;  %v3142_v42 = vld [vmem:[%s4938_s6 + $0x20] sm:$0xff]  ;;  %v3143_v43 = vld [vmem:[%s4938_s6 + $0x28] sm:$0xff] }
 0x2df   :  { %3583 = vmatprep.mubr.msk.f32.mxu1 %vm780_vm11, %v767_v15 }
 0x2e0   :  { %3584 = vmatmul.mubr.msk.f32.gmra.mrb[18].mxu1 %vm780_vm11, %v768_v51 }
 0x2e1   :  { %3621 = vmatprep.mubr.msk.f32.mxu1 %vm4187_vm0, %v4188_v6 }
 0x3a7   :  { %v3576_v57 = vpop.f32.mrb[12].mxu1 }
 0x3a8   :  { %v4538_v58 = vadd.f32 %v3576_v57, %v3114_v56  ;;  %v871_v61 = vpop.f32.mrb[13].mxu1 }
 0x3a9   :  { %v4540_v62 = vadd.f32 %v3114_v56, %v871_v61 }
 0x3aa   :  { %v981_v4 = vmul.f32 %v4538_v58, %v4538_v58 }
 0x3ab   :  { %v3970_v11 = vpack.c.bf16 %v4538_v58, %v4540_v62  ;;  %v980_v12 = vmul.f32 %v4540_v62, %v4540_v62  ;;  %v3579_v13 = vpop.f32.mrb[14].mxu1 }
 0x3ac   :  { %v4548_v16 = vadd.f32 %v3579_v13, %v3114_v56  ;;  %v881_v17 = vpop.f32.mrb[15].mxu1 }
 0x3ad   :  { %v3982_v18 = vpack.c.bf16 %v981_v4, %v980_v12  ;;  %v4550_v19 = vadd.f32 %v3114_v56, %v881_v17  ;;  %3971 = vmatpush3.bf16.msra.mxu0 %v3970_v11 }
 0x3ae   :  { %v983_v20 = vmul.f32 %v4548_v16, %v4548_v16  ;;  %3972 = vmatprep.subr.bf16.mxu0 %v4186_v3 }
 0x3af   :  { %v3973_v21 = vpack.c.bf16 %v4548_v16, %v4550_v19  ;;  %v982_v22 = vmul.f32 %v4550_v19, %v4550_v19  ;;  %v3582_v23 = vpop.f32.mrb[16].mxu1  ;;  %3983 = vmatpush3.bf16.msra.mxu1 %v3982_v18 }
 0x3b0   :  { %v4559_v24 = vadd.f32 %v3582_v23, %v3114_v56  ;;  %v891_v25 = vpop.f32.mrb[17].mxu1  ;;  %3984 = vmatprep.subr.bf16.mxu1 %v4186_v3 }
 0x3b1   :  { %v3985_v26 = vpack.c.bf16 %v983_v20, %v982_v22  ;;  %v4562_v28 = vadd.f32 %v3114_v56, %v891_v25  ;;  %3974 = vmatpush3.bf16.msra.mxu0 %v3973_v21 }
 0x3b2   :  { %v985_v29 = vmul.f32 %v4559_v24, %v4559_v24  ;;  %3975 = vmatprep.subr.bf16.mxu0 %v4186_v3 }
 0x3b3   :  { %v3976_v30 = vpack.c.bf16 %v4559_v24, %v4562_v28  ;;  %v984_v31 = vmul.f32 %v4562_v28, %v4562_v28  ;;  %v3585_v33 = vpop.f32.mrb[18].mxu1  ;;  %3986 = vmatpush3.bf16.msra.mxu1 %v3985_v26 }
 0x3b4   :  { %v907_v34 = vadd.f32 %v3585_v33, %v3114_v56  ;;  %v901_v35 = vpop.f32.mrb[19].mxu1  ;;  %3987 = vmatprep.subr.bf16.mxu1 %v4186_v3 }
 0x3b5   :  { %v3988_v36 = vpack.c.bf16 %v985_v29, %v984_v31  ;;  %v902_v37 = vadd.f32 %v3114_v56, %v901_v35  ;;  %3977 = vmatpush3.bf16.msra.mxu0 %v3976_v30 }
 0x3b6   :  { %v987_v38 = vmul.f32 %v907_v34, %v907_v34  ;;  %3978 = vmatprep.subr.bf16.mxu0 %v4186_v3 }
 0x3b7   :  { %v3979_v39 = vpack.c.bf16 %v907_v34, %v902_v37  ;;  %v986_v40 = vmul.f32 %v902_v37, %v902_v37  ;;  %3989 = vmatpush3.bf16.msra.mxu1 %v3988_v36 }
 0x3b8   :  { %3990 = vmatprep.subr.bf16.mxu1 %v4186_v3 }
 0x3b9   :  { %v3991_v41 = vpack.c.bf16 %v987_v38, %v986_v40  ;;  %3980 = vmatpush3.bf16.msra.mxu0 %v3979_v39 }
 0x3ba   :  { %3994 = vmatprep.subr.bf16.mxu0 %v3993_v45 }
 0x3bb   :  { %3992 = vmatpush3.bf16.msra.mxu1 %v3991_v41 }
 0x3bc   :  { %3603 = vmatmul.mubr.msk.f32.vlgmr.msra.gmra.mrb[16].mxu0 %vm294_vm1, %v4190_v27 }
 0x3bd   :  { %3996 = vmatpush3.bf16.msra.mxu0 %v3993_v45  ;;  %v4017_v45 = vpack.c.bf16 %v3143_v43, %v3142_v42  ;;  %v3147_v42 = vld [vmem:[%s4939_s7 + $0x1] ss:$0 sm:$0xff] }
 0x3be   :  { %3622 = vmatmul.mubr.msk.f32.vlgmr.msra.gmra.mrb[20].mxu1 %vm294_vm1, %v4190_v27  ;;  %3998 = vmatprep.subr.bf16.mxu0 %v3997_v46 }
 0x3bf   :  { %3660 = vmatprep.mubr.msk.f32.mxu1 %vm294_vm1, %v4476_v53 }
 0x3c1   :  { %4000 = vmatpush3.bf16.msra.mxu0 %v3997_v46  ;;  %v4021_v46 = vpack.c.bf16 %v3145_v0, %v3144_v44 }
 0x3c2   :  { %4018 = vmatprep.subr.bf16.mxu0 %v4017_v45 }
 0x48f   :  { %v976_v47 = vpop.f32.mrb[16].mxu0 }
 0x490   :  { %v1058_v48 = vmul.f32 0.015625, %v976_v47  ;;  %v3604_v49 = vpop.f32.mrb[17].mxu0  ;;  %v3125_v47 = vld [vmem:[%s4941_s9] ss:$0 sm:$0xff] }
 0x491   :  { %v1054_v1 = vpop.f32.mrb[20].mxu1 }
 0x492   :  { %v1060_v50 = vmul.f32 %v1058_v48, %v1058_v48  ;;  %v1059_v2 = vmul.f32 0.015625, %v1054_v1  ;;  %v3623_v5 = vpop.f32.mrb[21].mxu1  ;;  %v1066_v15 = vrot.slane %v1058_v48, %v4454_v32 }
 0x494   :  { %v1061_v8 = vsub.f32 %v1059_v2, %v1060_v50  ;;  %v1067_v56 = vsub.f32 %v4540_v62, %v1066_v15  ;;  %v1068_v61 = vsub.f32 %v4538_v58, %v1066_v15  ;;  %v1069_v4 = vsub.f32 %v4550_v19, %v1066_v15 }
 0x495   :  { %v1070_v11 = vsub.f32 %v4548_v16, %v1066_v15  ;;  %v1071_v12 = vsub.f32 %v4562_v28, %v1066_v15  ;;  %v1072_v13 = vsub.f32 %v4559_v24, %v1066_v15  ;;  %v1073_v17 = vsub.f32 %v902_v37, %v1066_v15 }
 0x496   :  { %v1062_v9 = vmax.f32 %v1061_v8, 0.0  ;;  %v1074_v18 = vsub.f32 %v907_v34, %v1066_v15 }
 0x498   :  { %v1075_v14 = vadd.f32 1e-05, %v1062_v9 }
 0x49a   :  { %4148 = vrsqrt.f32 %v1075_v14 }
 0x4a4   :  { %v4149_v51 = vpop.eup %4148 }
 0x4a5   :  { %v1080_v57 = vrot.slane %v4149_v51, %v4454_v32 }
 0x4a7   :  { %v1081_v20 = vmul.f32 %v1080_v57, %v1067_v56  ;;  %v1082_v21 = vmul.f32 %v1080_v57, %v1068_v61  ;;  %v1083_v22 = vmul.f32 %v1080_v57, %v1069_v4  ;;  %v1084_v23 = vmul.f32 %v1080_v57, %v1070_v11 }
 0x4a8   :  { %v1085_v25 = vmul.f32 %v1080_v57, %v1071_v12  ;;  %v1086_v62 = vmul.f32 %v1080_v57, %v1072_v13  ;;  %v1087_v26 = vmul.f32 %v1080_v57, %v1073_v17  ;;  %v1088_v29 = vmul.f32 %v1080_v57, %v1074_v18 }
 0x4a9   :  { %v1089_v30 = vadd.f32 0.0001, %v1081_v20  ;;  %v1090_v58 = vadd.f32 0.0001, %v1082_v21  ;;  %v1091_v31 = vadd.f32 0.0001, %v1083_v22 }
 0x4aa   :  { %v1092_v16 = vadd.f32 0.0001, %v1084_v23  ;;  %v1093_v24 = vadd.f32 0.0001, %v1085_v25  ;;  %v1094_v35 = vadd.f32 0.0001, %v1086_v62 }
 0x4ab   :  { %v1097_v19 = vmax.f32 %v1089_v30, 0.0  ;;  %v1098_v33 = vmax.f32 %v1090_v58, 0.0  ;;  %v1099_v28 = vmax.f32 %v1091_v31, 0.0  ;;  %v1095_v37 = vadd.f32 0.0001, %v1087_v26 }
 0x4ac   :  { %v1100_v34 = vmax.f32 %v1092_v16, 0.0  ;;  %v1101_v36 = vmax.f32 %v1093_v24, 0.0  ;;  %v1102_v38 = vmax.f32 %v1094_v35, 0.0  ;;  %v1096_v39 = vadd.f32 0.0001, %v1088_v29 }
 0x4ad   :  { %3632 = vmatprep.mubr.msk.f32.mxu0 %vm780_vm11, %v1097_v19  ;;  %v1103_v40 = vmax.f32 %v1095_v37, 0.0 }
 0x4ae   :  { %3633 = vmatmul.mubr.msk.f32.vlgmr.msra.gmra.mrb[18].mxu0 %vm780_vm11, %v1098_v33  ;;  %v1104_v41 = vmax.f32 %v1096_v39, 0.0 }
 0x4af   :  { %3635 = vmatprep.mubr.msk.f32.mxu0 %vm780_vm11, %v1099_v28  ;;  %4020 = vmatpush3.bf16.msra.mxu0 %v4017_v45 }
 0x4b0   :  { %4022 = vmatprep.subr.bf16.mxu0 %v4021_v46 }
 0x4b2   :  { %3636 = vmatmul.mubr.msk.f32.gmra.mrb[20].mxu0 %vm780_vm11, %v1100_v34 }
 0x4b3   :  { %3638 = vmatprep.mubr.msk.f32.mxu0 %vm780_vm11, %v1101_v36  ;;  %4024 = vmatpush3.bf16.msra.mxu0 %v4021_v46 }
 0x4b4   :  { %4037 = vmatprep.subr.bf16.mxu0 %v4186_v3 }
 0x4b6   :  { %3639 = vmatmul.mubr.msk.f32.gmra.mrb[22].mxu0 %vm780_vm11, %v1102_v38 }
 0x4b7   :  { %3641 = vmatprep.mubr.msk.f32.mxu0 %vm780_vm11, %v1103_v40 }
 0x4ba   :  { %3642 = vmatmul.mubr.msk.f32.gmra.mrb[24].mxu0 %vm780_vm11, %v1104_v41 }
 0x581   :  { %v3634_v48 = vpop.f32.mrb[18].mxu0 }
 0x582   :  { %v1212_v49 = vadd.f32 %v3634_v48, %v3125_v47  ;;  %v1206_v1 = vpop.f32.mrb[19].mxu0 }
 0x583   :  { %v1207_v50 = vadd.f32 %v3125_v47, %v1206_v1 }
 0x584   :  { %v1246_v2 = vmax.f32 %v1212_v49, 0.0 }
 0x585   :  { %v1245_v5 = vmax.f32 %v1207_v50, 0.0  ;;  %v3637_v8 = vpop.f32.mrb[20].mxu0 }
 0x586   :  { %v1222_v9 = vadd.f32 %v3637_v8, %v3125_v47  ;;  %v1216_v14 = vpop.f32.mrb[21].mxu0 }
 0x587   :  { %v4001_v15 = vpack.c.bf16 %v1246_v2, %v1245_v5  ;;  %v1217_v51 = vadd.f32 %v3125_v47, %v1216_v14 }
 0x588   :  { %v1248_v56 = vmax.f32 %v1222_v9, 0.0 }
 0x589   :  { %v1247_v57 = vmax.f32 %v1217_v51, 0.0  ;;  %v3640_v61 = vpop.f32.mrb[22].mxu0  ;;  %4002 = vmatprep.subr.bf16.mxu1 %v4001_v15 }
 0x58a   :  { %v1232_v4 = vadd.f32 %v3640_v61, %v3125_v47  ;;  %v1226_v11 = vpop.f32.mrb[23].mxu0  ;;  %4004 = vmatpush3.bf16.msra.mxu1 %v4001_v15 }
 0x58b   :  { %v4005_v12 = vpack.c.bf16 %v1248_v56, %v1247_v57  ;;  %v1227_v13 = vadd.f32 %v3125_v47, %v1226_v11 }
 0x58c   :  { %v1250_v17 = vmax.f32 %v1232_v4, 0.0 }
 0x58d   :  { %v1249_v18 = vmax.f32 %v1227_v13, 0.0  ;;  %v3643_v20 = vpop.f32.mrb[24].mxu0  ;;  %4006 = vmatprep.subr.bf16.mxu1 %v4005_v12 }
 0x58e   :  { %v1242_v21 = vadd.f32 %v3643_v20, %v3125_v47  ;;  %v1236_v22 = vpop.f32.mrb[25].mxu0  ;;  %4008 = vmatpush3.bf16.msra.mxu1 %v4005_v12 }
 0x58f   :  { %v4009_v23 = vpack.c.bf16 %v1250_v17, %v1249_v18  ;;  %v1237_v25 = vadd.f32 %v3125_v47, %v1236_v22 }
 0x590   :  { %v1252_v62 = vmax.f32 %v1242_v21, 0.0 }
 0x591   :  { %v1251_v26 = vmax.f32 %v1237_v25, 0.0  ;;  %4010 = vmatprep.subr.bf16.mxu1 %v4009_v23 }
 0x592   :  { %4012 = vmatpush3.bf16.msra.mxu1 %v4009_v23 }
 0x593   :  { %v4013_v29 = vpack.c.bf16 %v1252_v62, %v1251_v26 }
 0x595   :  { %4014 = vmatprep.subr.bf16.mxu1 %v4013_v29 }
 0x596   :  { %4016 = vmatpush3.bf16.msra.mxu1 %v4013_v29  ;;  %v3159_v29 = vld [vmem:[%s4940_s8 + $0x28] sm:$0xff] }
 0x597   :  { %4025 = vmatprep.subr.bf16.mxu1 %v4186_v3 }
 0x599   :  { %3661 = vmatmul.mubr.msk.f32.vlgmr.msra.gmra.mrb[22].mxu1 %vm294_vm1, %v4482_v55 }
 0x59a   :  { %3663 = vmatprep.mubr.msk.f32.mxu1 %vm294_vm1, %v4474_v52 }
 0x59d   :  { %3664 = vmatmul.mubr.msk.f32.gmra.mrb[24].mxu1 %vm294_vm1, %v4478_v54 }
 0x59e   :  { %3666 = vmatprep.mubr.msk.f32.mxu1 %vm294_vm1, %v4498_v63 }
 0x5a1   :  { %3667 = vmatmul.mubr.msk.f32.gmra.mrb[26].mxu1 %vm294_vm1, %v4502_v10 }
 0x5a2   :  { %3669 = vmatprep.mubr.msk.f32.mxu1 %vm294_vm1, %v4493_v59 }
 0x5a5   :  { %3670 = vmatmul.mubr.msk.f32.gmra.mrb[28].mxu1 %vm294_vm1, %v4500_v7 }
 0x5a6   :  { %3708 = vmatprep.mubr.msk.f32.mxu1 %vm4187_vm0, %v4188_v6 }
 0x66c   :  { %v3662_v30 = vpop.f32.mrb[22].mxu1 }
 0x66d   :  { %v1319_v58 = vpop.f32.mrb[23].mxu1  ;;  %v1359_v19 = vadd.f32 %v3662_v30, %v1246_v2  ;;  %v3160_v30 = vld [vmem:[%s4940_s8 + $0x30] sm:$0xff] }
 0x66e   :  { %v1358_v31 = vadd.f32 %v1319_v58, %v1245_v5 }
 0x670   :  { %v3665_v33 = vpop.f32.mrb[24].mxu1  ;;  %3680 = vmatprep.mubr.msk.f32.mxu0 %vm780_vm11, %v1358_v31  ;;  %v3161_v31 = vld [vmem:[%s4940_s8 + $0x38] sm:$0xff] }
 0x671   :  { %v1329_v16 = vpop.f32.mrb[25].mxu1  ;;  %3681 = vmatmul.mubr.msk.f32.vlgmr.msra.gmra.mrb[26].mxu0 %vm780_vm11, %v1359_v19  ;;  %v1361_v24 = vadd.f32 %v3665_v33, %v1248_v56  ;;  %v4053_v19 = vpack.c.bf16 %v3161_v31, %v3160_v30 }
 0x672   :  { %v1360_v28 = vadd.f32 %v1329_v16, %v1247_v57 }
 0x674   :  { %v3668_v34 = vpop.f32.mrb[26].mxu1  ;;  %3683 = vmatprep.mubr.msk.f32.mxu0 %vm780_vm11, %v1360_v28 }
 0x675   :  { %v1339_v35 = vpop.f32.mrb[27].mxu1  ;;  %3684 = vmatmul.mubr.msk.f32.gmra.mrb[28].mxu0 %vm780_vm11, %v1361_v24  ;;  %v1363_v37 = vadd.f32 %v3668_v34, %v1250_v17 }
 0x676   :  { %v1362_v36 = vadd.f32 %v1339_v35, %v1249_v18 }
 0x678   :  { %v3671_v38 = vpop.f32.mrb[28].mxu1  ;;  %3686 = vmatprep.mubr.msk.f32.mxu0 %vm780_vm11, %v1362_v36 }
 0x679   :  { %v1349_v39 = vpop.f32.mrb[29].mxu1  ;;  %3687 = vmatmul.mubr.msk.f32.gmra.mrb[30].mxu0 %vm780_vm11, %v1363_v37  ;;  %v1365_v41 = vadd.f32 %v3671_v38, %v1252_v62 }
 0x67a   :  { %v1364_v40 = vadd.f32 %v1349_v39, %v1251_v26  ;;  %v3158_v26 = vld [vmem:[%s4940_s8 + $0x20] sm:$0xff] }
 0x67b   :  { %v4049_v58 = vpack.c.bf16 %v3159_v29, %v3158_v26  ;;  %v3181_v26 = vld [vmem:[%s4938_s6 + $0x48] sm:$0xff]  ;;  %v3182_v29 = vld [vmem:[%s4938_s6 + $0x50] sm:$0xff] }
 0x67c   :  { %3689 = vmatprep.mubr.msk.f32.mxu0 %vm780_vm11, %v1364_v40 }
 0x67d   :  { %3690 = vmatmul.mubr.msk.f32.gmra.mrb[32].mxu0 %vm780_vm11, %v1365_v41 }
 0x67e   :  { %3727 = vmatprep.mubr.msk.f32.mxu0 %vm4187_vm0, %v4188_v6 }
 0x744   :  { %v3682_v43 = vpop.f32.mrb[26].mxu0 }
 0x745   :  { %v4654_v44 = vadd.f32 %v3682_v43, %v3147_v42  ;;  %v1469_v45 = vpop.f32.mrb[27].mxu0 }
 0x746   :  { %v4656_v0 = vadd.f32 %v3147_v42, %v1469_v45 }
 0x747   :  { %v1579_v46 = vmul.f32 %v4654_v44, %v4654_v44 }
 0x748   :  { %v4026_v47 = vpack.c.bf16 %v4654_v44, %v4656_v0  ;;  %v1578_v48 = vmul.f32 %v4656_v0, %v4656_v0  ;;  %v3685_v49 = vpop.f32.mrb[28].mxu0 }
 0x749   :  { %v4664_v1 = vadd.f32 %v3685_v49, %v3147_v42  ;;  %v1479_v50 = vpop.f32.mrb[29].mxu0 }
 0x74a   :  { %v4038_v2 = vpack.c.bf16 %v1579_v46, %v1578_v48  ;;  %v4666_v5 = vadd.f32 %v3147_v42, %v1479_v50  ;;  %4027 = vmatpush3.bf16.msra.mxu1 %v4026_v47 }
 0x74b   :  { %v1581_v8 = vmul.f32 %v4664_v1, %v4664_v1  ;;  %4028 = vmatprep.subr.bf16.mxu1 %v4186_v3 }
 0x74c   :  { %v4029_v9 = vpack.c.bf16 %v4664_v1, %v4666_v5  ;;  %v1580_v14 = vmul.f32 %v4666_v5, %v4666_v5  ;;  %v3688_v15 = vpop.f32.mrb[30].mxu0  ;;  %4039 = vmatpush3.bf16.msra.mxu0 %v4038_v2 }
 0x74d   :  { %v4675_v51 = vadd.f32 %v3688_v15, %v3147_v42  ;;  %v1489_v56 = vpop.f32.mrb[31].mxu0  ;;  %4040 = vmatprep.subr.bf16.mxu0 %v4186_v3 }
 0x74e   :  { %v4041_v57 = vpack.c.bf16 %v1581_v8, %v1580_v14  ;;  %v4678_v61 = vadd.f32 %v3147_v42, %v1489_v56  ;;  %4030 = vmatpush3.bf16.msra.mxu1 %v4029_v9 }
 0x74f   :  { %v1583_v4 = vmul.f32 %v4675_v51, %v4675_v51  ;;  %4031 = vmatprep.subr.bf16.mxu1 %v4186_v3 }
 0x750   :  { %v4032_v11 = vpack.c.bf16 %v4675_v51, %v4678_v61  ;;  %v1582_v12 = vmul.f32 %v4678_v61, %v4678_v61  ;;  %v3691_v13 = vpop.f32.mrb[32].mxu0  ;;  %4042 = vmatpush3.bf16.msra.mxu0 %v4041_v57 }
 0x751   :  { %v1505_v17 = vadd.f32 %v3691_v13, %v3147_v42  ;;  %v1499_v18 = vpop.f32.mrb[33].mxu0  ;;  %4043 = vmatprep.subr.bf16.mxu0 %v4186_v3 }
 0x752   :  { %v4044_v20 = vpack.c.bf16 %v1583_v4, %v1582_v12  ;;  %v1500_v21 = vadd.f32 %v3147_v42, %v1499_v18  ;;  %4033 = vmatpush3.bf16.msra.mxu1 %v4032_v11 }
 0x753   :  { %v1585_v22 = vmul.f32 %v1505_v17, %v1505_v17  ;;  %4034 = vmatprep.subr.bf16.mxu1 %v4186_v3 }
 0x754   :  { %v4035_v23 = vpack.c.bf16 %v1505_v17, %v1500_v21  ;;  %v1584_v25 = vmul.f32 %v1500_v21, %v1500_v21  ;;  %4045 = vmatpush3.bf16.msra.mxu0 %v4044_v20 }
 0x755   :  { %4046 = vmatprep.subr.bf16.mxu0 %v4186_v3 }
 0x756   :  { %v4047_v62 = vpack.c.bf16 %v1585_v22, %v1584_v25  ;;  %4036 = vmatpush3.bf16.msra.mxu1 %v4035_v23 }
 0x757   :  { %4050 = vmatprep.subr.bf16.mxu1 %v4049_v58 }
 0x758   :  { %4048 = vmatpush3.bf16.msra.mxu0 %v4047_v62  ;;  %v3180_v62 = vld [vmem:[%s4938_s6 + $0x40] sm:$0xff] }
 0x759   :  { %3709 = vmatmul.mubr.msk.f32.vlgmr.msra.gmra.mrb[30].mxu1 %vm294_vm1, %v4190_v27  ;;  %v4073_v30 = vpack.c.bf16 %v3181_v26, %v3180_v62 }
 0x75a   :  { %4052 = vmatpush3.bf16.msra.mxu1 %v4049_v58  ;;  %v3183_v58 = vld [vmem:[%s4938_s6 + $0x58] sm:$0xff] }
 0x75b   :  { %3728 = vmatmul.mubr.msk.f32.vlgmr.msra.gmra.mrb[34].mxu0 %vm294_vm1, %v4190_v27  ;;  %4054 = vmatprep.subr.bf16.mxu1 %v4053_v19  ;;  %v4077_v31 = vpack.c.bf16 %v3183_v58, %v3182_v29 }
 0x75c   :  { %3766 = vmatprep.mubr.msk.f32.mxu0 %vm294_vm1, %v4476_v53 }
 0x75e   :  { %4056 = vmatpush3.bf16.msra.mxu1 %v4053_v19  ;;  %v3163_v19 = vld [vmem:[%s4941_s9 + $0x1] ss:$0 sm:$0xff] }
 0x75f   :  { %4074 = vmatprep.subr.bf16.mxu1 %v4073_v30 }
 0x82c   :  { %v1574_v53 = vpop.f32.mrb[30].mxu1 }
 0x82d   :  { %v1656_v33 = vmul.f32 0.015625, %v1574_v53  ;;  %v3710_v16 = vpop.f32.mrb[31].mxu1 }
 0x82e   :  { %v1652_v28 = vpop.f32.mrb[34].mxu0 }
 0x82f   :  { %v1658_v24 = vmul.f32 %v1656_v33, %v1656_v33  ;;  %v1657_v34 = vmul.f32 0.015625, %v1652_v28  ;;  %v3729_v35 = vpop.f32.mrb[35].mxu0  ;;  %v1664_v39 = vrot.slane %v1656_v33, %v4454_v32 }
 0x831   :  { %v1659_v36 = vsub.f32 %v1657_v34, %v1658_v24  ;;  %v1665_v41 = vsub.f32 %v4656_v0, %v1664_v39  ;;  %v1666_v43 = vsub.f32 %v4654_v44, %v1664_v39  ;;  %v1667_v45 = vsub.f32 %v4666_v5, %v1664_v39 }
 0x832   :  { %v1668_v46 = vsub.f32 %v4664_v1, %v1664_v39  ;;  %v1669_v47 = vsub.f32 %v4678_v61, %v1664_v39  ;;  %v1670_v48 = vsub.f32 %v4675_v51, %v1664_v39  ;;  %v1671_v49 = vsub.f32 %v1500_v21, %v1664_v39 }
 0x833   :  { %v1660_v37 = vmax.f32 %v1659_v36, 0.0  ;;  %v1672_v50 = vsub.f32 %v1505_v17, %v1664_v39 }
 0x835   :  { %v1673_v38 = vadd.f32 1e-05, %v1660_v37 }
 0x837   :  { %4150 = vrsqrt.f32 %v1673_v38 }
 0x841   :  { %v4151_v40 = vpop.eup %4150 }
 0x842   :  { %v1678_v42 = vrot.slane %v4151_v40, %v4454_v32 }
 0x844   :  { %v1679_v2 = vmul.f32 %v1678_v42, %v1665_v41  ;;  %v1680_v8 = vmul.f32 %v1678_v42, %v1666_v43  ;;  %v1681_v9 = vmul.f32 %v1678_v42, %v1667_v45  ;;  %v1682_v14 = vmul.f32 %v1678_v42, %v1668_v46 }
 0x845   :  { %v1683_v15 = vmul.f32 %v1678_v42, %v1669_v47  ;;  %v1684_v0 = vmul.f32 %v1678_v42, %v1670_v48  ;;  %v1685_v56 = vmul.f32 %v1678_v42, %v1671_v49  ;;  %v1686_v57 = vmul.f32 %v1678_v42, %v1672_v50 }
 0x846   :  { %v1687_v4 = vadd.f32 0.0001, %v1679_v2  ;;  %v1688_v44 = vadd.f32 0.0001, %v1680_v8  ;;  %v1689_v11 = vadd.f32 0.0001, %v1681_v9 }
 0x847   :  { %v1690_v1 = vadd.f32 0.0001, %v1682_v14  ;;  %v1691_v51 = vadd.f32 0.0001, %v1683_v15  ;;  %v1692_v17 = vadd.f32 0.0001, %v1684_v0 }
 0x848   :  { %v1695_v5 = vmax.f32 %v1687_v4, 0.0  ;;  %v1696_v12 = vmax.f32 %v1688_v44, 0.0  ;;  %v1697_v61 = vmax.f32 %v1689_v11, 0.0  ;;  %v1693_v20 = vadd.f32 0.0001, %v1685_v56 }
 0x849   :  { %v1698_v13 = vmax.f32 %v1690_v1, 0.0  ;;  %v1699_v18 = vmax.f32 %v1691_v51, 0.0  ;;  %v1700_v21 = vmax.f32 %v1692_v17, 0.0  ;;  %v1694_v22 = vadd.f32 0.0001, %v1686_v57 }
 0x84a   :  { %3738 = vmatprep.mubr.msk.f32.mxu1 %vm780_vm11, %v1695_v5  ;;  %v1701_v23 = vmax.f32 %v1693_v20, 0.0 }
 0x84b   :  { %3739 = vmatmul.mubr.msk.f32.vlgmr.msra.gmra.mrb[32].mxu1 %vm780_vm11, %v1696_v12  ;;  %v1702_v25 = vmax.f32 %v1694_v22, 0.0 }
 0x84c   :  { %3741 = vmatprep.mubr.msk.f32.mxu1 %vm780_vm11, %v1697_v61  ;;  %4076 = vmatpush3.bf16.msra.mxu1 %v4073_v30 }
 0x84d   :  { %4078 = vmatprep.subr.bf16.mxu1 %v4077_v31 }
 0x84f   :  { %3742 = vmatmul.mubr.msk.f32.gmra.mrb[34].mxu1 %vm780_vm11, %v1698_v13  ;;  %v3185_v13 = vld [vmem:[%s4939_s7 + $0x2] ss:$0 sm:$0xff] }
 0x850   :  { %3744 = vmatprep.mubr.msk.f32.mxu1 %vm780_vm11, %v1699_v18  ;;  %4080 = vmatpush3.bf16.msra.mxu1 %v4077_v31 }
 0x851   :  { %4093 = vmatprep.subr.bf16.mxu1 %v4186_v3 }
 0x853   :  { %3745 = vmatmul.mubr.msk.f32.gmra.mrb[36].mxu1 %vm780_vm11, %v1700_v21 }
 0x854   :  { %3747 = vmatprep.mubr.msk.f32.mxu1 %vm780_vm11, %v1701_v23 }
 0x857   :  { %3748 = vmatmul.mubr.msk.f32.gmra.mrb[38].mxu1 %vm780_vm11, %v1702_v25 }
 0x91e   :  { %v3740_v53 = vpop.f32.mrb[32].mxu1 }
 0x91f   :  { %v1812_v33 = vadd.f32 %v3740_v53, %v3163_v19  ;;  %v1806_v16 = vpop.f32.mrb[33].mxu1 }
 0x920   :  { %v1807_v28 = vadd.f32 %v3163_v19, %v1806_v16 }
 0x921   :  { %v1846_v24 = vmax.f32 %v1812_v33, 0.0 }
 0x922   :  { %v1845_v34 = vmax.f32 %v1807_v28, 0.0  ;;  %v3743_v35 = vpop.f32.mrb[34].mxu1 }
 0x923   :  { %v1822_v36 = vadd.f32 %v3743_v35, %v3163_v19  ;;  %v1816_v37 = vpop.f32.mrb[35].mxu1 }
 0x924   :  { %v4057_v38 = vpack.c.bf16 %v1846_v24, %v1845_v34  ;;  %v1817_v39 = vadd.f32 %v3163_v19, %v1816_v37 }
 0x925   :  { %v1848_v40 = vmax.f32 %v1822_v36, 0.0 }
 0x926   :  { %v1847_v41 = vmax.f32 %v1817_v39, 0.0  ;;  %v3746_v42 = vpop.f32.mrb[36].mxu1  ;;  %4058 = vmatprep.subr.bf16.mxu0 %v4057_v38 }
 0x927   :  { %v1832_v43 = vadd.f32 %v3746_v42, %v3163_v19  ;;  %v1826_v45 = vpop.f32.mrb[37].mxu1  ;;  %4060 = vmatpush3.bf16.msra.mxu0 %v4057_v38 }
 0x928   :  { %v4061_v46 = vpack.c.bf16 %v1848_v40, %v1847_v41  ;;  %v1827_v47 = vadd.f32 %v3163_v19, %v1826_v45 }
 0x929   :  { %v1850_v48 = vmax.f32 %v1832_v43, 0.0 }
 0x92a   :  { %v1849_v49 = vmax.f32 %v1827_v47, 0.0  ;;  %v3749_v50 = vpop.f32.mrb[38].mxu1  ;;  %4062 = vmatprep.subr.bf16.mxu0 %v4061_v46 }
 0x92b   :  { %v1842_v2 = vadd.f32 %v3749_v50, %v3163_v19  ;;  %v1836_v8 = vpop.f32.mrb[39].mxu1  ;;  %4064 = vmatpush3.bf16.msra.mxu0 %v4061_v46  ;;  %v3198_v50 = vld [vmem:[%s4940_s8 + $0x50] sm:$0xff] }
 0x92c   :  { %v4065_v9 = vpack.c.bf16 %v1850_v48, %v1849_v49  ;;  %v1837_v14 = vadd.f32 %v3163_v19, %v1836_v8  ;;  %v3199_v8 = vld [vmem:[%s4940_s8 + $0x58] sm:$0xff] }
 0x92d   :  { %v1852_v15 = vmax.f32 %v1842_v2, 0.0 }
 0x92e   :  { %v1851_v0 = vmax.f32 %v1837_v14, 0.0  ;;  %4066 = vmatprep.subr.bf16.mxu0 %v4065_v9 }
 0x92f   :  { %4068 = vmatpush3.bf16.msra.mxu0 %v4065_v9  ;;  %v4109_v9 = vpack.c.bf16 %v3199_v8, %v3198_v50 }
 0x930   :  { %v4069_v56 = vpack.c.bf16 %v1852_v15, %v1851_v0 }
 0x932   :  { %4070 = vmatprep.subr.bf16.mxu0 %v4069_v56 }
 0x933   :  { %4072 = vmatpush3.bf16.msra.mxu0 %v4069_v56 }
 0x934   :  { %4081 = vmatprep.subr.bf16.mxu0 %v4186_v3 }
 0x936   :  { %3767 = vmatmul.mubr.msk.f32.vlgmr.msra.gmra.mrb[36].mxu0 %vm294_vm1, %v4482_v55 }
 0x937   :  { %3769 = vmatprep.mubr.msk.f32.mxu0 %vm294_vm1, %v4474_v52 }
 0x93a   :  { %3770 = vmatmul.mubr.msk.f32.gmra.mrb[38].mxu0 %vm294_vm1, %v4478_v54 }
 0x93b   :  { %3772 = vmatprep.mubr.msk.f32.mxu0 %vm294_vm1, %v4498_v63 }
 0x93e   :  { %3773 = vmatmul.mubr.msk.f32.gmra.mrb[40].mxu0 %vm294_vm1, %v4502_v10 }
 0x93f   :  { %3775 = vmatprep.mubr.msk.f32.mxu0 %vm294_vm1, %v4493_v59 }
 0x942   :  { %3776 = vmatmul.mubr.msk.f32.gmra.mrb[42].mxu0 %vm294_vm1, %v4500_v7 }
 0x943   :  { %3814 = vmatprep.mubr.msk.f32.mxu0 %vm4187_vm0, %v4188_v6 }
 0xa09   :  { %v3768_v55 = vpop.f32.mrb[36].mxu0 }
 0xa0a   :  { %v1919_v52 = vpop.f32.mrb[37].mxu0  ;;  %v1959_v4 = vadd.f32 %v3768_v55, %v1846_v24 }
 0xa0b   :  { %v1958_v57 = vadd.f32 %v1919_v52, %v1845_v34 }
 0xa0d   :  { %v3771_v54 = vpop.f32.mrb[38].mxu0  ;;  %3786 = vmatprep.mubr.msk.f32.mxu1 %vm780_vm11, %v1958_v57 }
 0xa0e   :  { %v1929_v63 = vpop.f32.mrb[39].mxu0  ;;  %3787 = vmatmul.mubr.msk.f32.vlgmr.msra.gmra.mrb[40].mxu1 %vm780_vm11, %v1959_v4  ;;  %v1961_v44 = vadd.f32 %v3771_v54, %v1848_v40 }
 0xa0f   :  { %v1960_v10 = vadd.f32 %v1929_v63, %v1847_v41 }
 0xa11   :  { %v3774_v11 = vpop.f32.mrb[40].mxu0  ;;  %3789 = vmatprep.mubr.msk.f32.mxu1 %vm780_vm11, %v1960_v10 }
 0xa12   :  { %v1939_v59 = vpop.f32.mrb[41].mxu0  ;;  %3790 = vmatmul.mubr.msk.f32.gmra.mrb[42].mxu1 %vm780_vm11, %v1961_v44  ;;  %v1963_v5 = vadd.f32 %v3774_v11, %v1850_v48  ;;  %v3196_v48 = vld [vmem:[%s4940_s8 + $0x40] sm:$0xff] }
 0xa13   :  { %v1962_v7 = vadd.f32 %v1939_v59, %v1849_v49  ;;  %v3197_v49 = vld [vmem:[%s4940_s8 + $0x48] sm:$0xff] }
 0xa14   :  { %v4105_v2 = vpack.c.bf16 %v3197_v49, %v3196_v48 }
 0xa15   :  { %v3777_v12 = vpop.f32.mrb[42].mxu0  ;;  %3792 = vmatprep.mubr.msk.f32.mxu1 %vm780_vm11, %v1962_v7 }
 0xa16   :  { %v1949_v1 = vpop.f32.mrb[43].mxu0  ;;  %3793 = vmatmul.mubr.msk.f32.gmra.mrb[44].mxu1 %vm780_vm11, %v1963_v5  ;;  %v1965_v51 = vadd.f32 %v3777_v12, %v1852_v15 }
 0xa17   :  { %v1964_v61 = vadd.f32 %v1949_v1, %v1851_v0 }
 0xa19   :  { %3795 = vmatprep.mubr.msk.f32.mxu1 %vm780_vm11, %v1964_v61 }
 0xa1a   :  { %3796 = vmatmul.mubr.msk.f32.gmra.mrb[46].mxu1 %vm780_vm11, %v1965_v51 }
 0xa1b   :  { %3833 = vmatprep.mubr.msk.f32.mxu1 %vm4187_vm0, %v4188_v6 }
 0xae1   :  { %v3788_v17 = vpop.f32.mrb[40].mxu1 }
 0xae2   :  { %v4770_v18 = vadd.f32 %v3788_v17, %v3185_v13  ;;  %v2069_v20 = vpop.f32.mrb[41].mxu1 }
 0xae3   :  { %v4772_v21 = vadd.f32 %v3185_v13, %v2069_v20 }
 0xae4   :  { %v2179_v22 = vmul.f32 %v4770_v18, %v4770_v18 }
 0xae5   :  { %v4082_v23 = vpack.c.bf16 %v4770_v18, %v4772_v21  ;;  %v2178_v25 = vmul.f32 %v4772_v21, %v4772_v21  ;;  %v3791_v62 = vpop.f32.mrb[42].mxu1 }
 0xae6   :  { %v4780_v26 = vadd.f32 %v3791_v62, %v3185_v13  ;;  %v2079_v29 = vpop.f32.mrb[43].mxu1 }
 0xae7   :  { %v4094_v30 = vpack.c.bf16 %v2179_v22, %v2178_v25  ;;  %v4782_v58 = vadd.f32 %v3185_v13, %v2079_v29  ;;  %4083 = vmatpush3.bf16.msra.mxu0 %v4082_v23 }
 0xae8   :  { %v2181_v31 = vmul.f32 %v4780_v26, %v4780_v26  ;;  %4084 = vmatprep.subr.bf16.mxu0 %v4186_v3 }
 0xae9   :  { %v4085_v19 = vpack.c.bf16 %v4780_v26, %v4782_v58  ;;  %v2180_v53 = vmul.f32 %v4782_v58, %v4782_v58  ;;  %v3794_v33 = vpop.f32.mrb[44].mxu1  ;;  %4095 = vmatpush3.bf16.msra.mxu1 %v4094_v30 }
 0xaea   :  { %v4791_v16 = vadd.f32 %v3794_v33, %v3185_v13  ;;  %v2089_v28 = vpop.f32.mrb[45].mxu1  ;;  %4096 = vmatprep.subr.bf16.mxu1 %v4186_v3 }
 0xaeb   :  { %v4097_v24 = vpack.c.bf16 %v2181_v31, %v2180_v53  ;;  %v4794_v34 = vadd.f32 %v3185_v13, %v2089_v28  ;;  %4086 = vmatpush3.bf16.msra.mxu0 %v4085_v19 }
 0xaec   :  { %v2183_v35 = vmul.f32 %v4791_v16, %v4791_v16  ;;  %4087 = vmatprep.subr.bf16.mxu0 %v4186_v3 }
 0xaed   :  { %v4088_v36 = vpack.c.bf16 %v4791_v16, %v4794_v34  ;;  %v2182_v37 = vmul.f32 %v4794_v34, %v4794_v34  ;;  %v3797_v38 = vpop.f32.mrb[46].mxu1  ;;  %4098 = vmatpush3.bf16.msra.mxu1 %v4097_v24 }
 0xaee   :  { %v2105_v39 = vadd.f32 %v3797_v38, %v3185_v13  ;;  %v2099_v40 = vpop.f32.mrb[47].mxu1  ;;  %4099 = vmatprep.subr.bf16.mxu1 %v4186_v3 }
 0xaef   :  { %v4100_v41 = vpack.c.bf16 %v2183_v35, %v2182_v37  ;;  %v2100_v42 = vadd.f32 %v3185_v13, %v2099_v40  ;;  %4089 = vmatpush3.bf16.msra.mxu0 %v4088_v36 }
 0xaf0   :  { %v2185_v43 = vmul.f32 %v2105_v39, %v2105_v39  ;;  %4090 = vmatprep.subr.bf16.mxu0 %v4186_v3 }
 0xaf1   :  { %v4091_v45 = vpack.c.bf16 %v2105_v39, %v2100_v42  ;;  %v2184_v46 = vmul.f32 %v2100_v42, %v2100_v42  ;;  %4101 = vmatpush3.bf16.msra.mxu1 %v4100_v41 }
 0xaf2   :  { %4102 = vmatprep.subr.bf16.mxu1 %v4186_v3 }
 0xaf3   :  { %v4103_v47 = vpack.c.bf16 %v2185_v43, %v2184_v46  ;;  %4092 = vmatpush3.bf16.msra.mxu0 %v4091_v45 }
 0xaf4   :  { %4106 = vmatprep.subr.bf16.mxu0 %v4105_v2 }
 0xaf5   :  { %4104 = vmatpush3.bf16.msra.mxu1 %v4103_v47 }
 0xaf6   :  { %3815 = vmatmul.mubr.msk.f32.vlgmr.msra.gmra.mrb[44].mxu0 %vm294_vm1, %v4190_v27  ;;  %4113 = vmatprep.subr.bf16.mxu1 %v4186_v3 }
 0xaf7   :  { %4108 = vmatpush3.bf16.msra.mxu0 %v4105_v2 }
 0xaf8   :  { %3834 = vmatmul.mubr.msk.f32.vlgmr.msra.gmra.mrb[48].mxu1 %vm294_vm1, %v4190_v27  ;;  %4110 = vmatprep.subr.bf16.mxu0 %v4109_v9 }
 0xaf9   :  { %3872 = vmatprep.mubr.msk.f32.mxu1 %vm4187_vm0, %v4188_v6 }
 0xafb   :  { %4112 = vmatpush3.bf16.msra.mxu0 %v4109_v9 }
 0xafc   :  { %4125 = vmatprep.subr.bf16.mxu0 %v4186_v3 }
 0xbc9   :  { %v2174_v14 = vpop.f32.mrb[44].mxu0 }
 0xbca   :  { %v2256_v15 = vmul.f32 0.015625, %v2174_v14  ;;  %v3816_v0 = vpop.f32.mrb[45].mxu0 }
 0xbcb   :  { %v2252_v56 = vpop.f32.mrb[48].mxu1 }
 0xbcc   :  { %v2258_v55 = vmul.f32 %v2256_v15, %v2256_v15  ;;  %v2257_v52 = vmul.f32 0.015625, %v2252_v56  ;;  %v3835_v57 = vpop.f32.mrb[49].mxu1  ;;  %v2264_v10 = vrot.slane %v2256_v15, %v4454_v32 }
 0xbce   :  { %v2259_v4 = vsub.f32 %v2257_v52, %v2258_v55  ;;  %v2265_v11 = vsub.f32 %v4772_v21, %v2264_v10  ;;  %v2266_v7 = vsub.f32 %v4770_v18, %v2264_v10  ;;  %v2267_v5 = vsub.f32 %v4782_v58, %v2264_v10 }
 0xbcf   :  { %v2268_v12 = vsub.f32 %v4780_v26, %v2264_v10  ;;  %v2269_v1 = vsub.f32 %v4794_v34, %v2264_v10  ;;  %v2270_v61 = vsub.f32 %v4791_v16, %v2264_v10  ;;  %v2271_v51 = vsub.f32 %v2100_v42, %v2264_v10 }
 0xbd0   :  { %v2260_v54 = vmax.f32 %v2259_v4, 0.0  ;;  %v2272_v13 = vsub.f32 %v2105_v39, %v2264_v10  ;;  %v3201_v39 = vld [vmem:[%s4941_s9 + $0x2] ss:$0 sm:$0xff] }
 0xbd2   :  { %v2273_v63 = vadd.f32 1e-05, %v2260_v54 }
 0xbd4   :  { %4152 = vrsqrt.f32 %v2273_v63 }
 0xbde   :  { %v4153_v44 = vpop.eup %4152 }
 0xbdf   :  { %v2278_v59 = vrot.slane %v4153_v44, %v4454_v32 }
 0xbe1   :  { %v2279_v17 = vmul.f32 %v2278_v59, %v2265_v11  ;;  %v2280_v20 = vmul.f32 %v2278_v59, %v2266_v7  ;;  %v2281_v22 = vmul.f32 %v2278_v59, %v2267_v5  ;;  %v2282_v23 = vmul.f32 %v2278_v59, %v2268_v12  ;;  %v3093_v11 = vld [vmem:[%s4935_s3] ss:$0 sm:$0xff] }
 0xbe2   :  { %v2283_v25 = vmul.f32 %v2278_v59, %v2269_v1  ;;  %v2284_v21 = vmul.f32 %v2278_v59, %v2270_v61  ;;  %v2285_v62 = vmul.f32 %v2278_v59, %v2271_v51  ;;  %v2286_v29 = vmul.f32 %v2278_v59, %v2272_v13  ;;  %v2689_v13 = vld [vmem:[%s4942_s10 + $0x8] sm:$0xff] }
 0xbe3   :  { %v2287_v30 = vadd.f32 0.0001, %v2279_v17  ;;  %v2288_v18 = vadd.f32 0.0001, %v2280_v20  ;;  %v2289_v31 = vadd.f32 0.0001, %v2281_v22  ;;  %vm283_vm12 = vcmp.eq.s32.totalorder %v4421_v60, %v3093_v11 }
 0xbe4   :  { %v2290_v26 = vadd.f32 0.0001, %v2282_v23  ;;  %v2291_v33 = vadd.f32 0.0001, %v2283_v25  ;;  %v2292_v28 = vadd.f32 0.0001, %v2284_v21 }
 0xbe5   :  { %v2295_v58 = vmax.f32 %v2287_v30, 0.0  ;;  %v2296_v19 = vmax.f32 %v2288_v18, 0.0  ;;  %v2297_v53 = vmax.f32 %v2289_v31, 0.0  ;;  %v2293_v34 = vadd.f32 0.0001, %v2285_v62  ;;  %v2688_v60 = vld [vmem:[%s4942_s10] sm:$0xff] }
 0xbe6   :  { %v2298_v16 = vmax.f32 %v2290_v26, 0.0  ;;  %v2299_v24 = vmax.f32 %v2291_v33, 0.0  ;;  %v2300_v35 = vmax.f32 %v2292_v28, 0.0  ;;  %v2294_v36 = vadd.f32 0.0001, %v2286_v29  ;;  %v2690_v20 = vld [vmem:[%s4942_s10 + $0x10] sm:$0xff] }
 0xbe7   :  { %3844 = vmatprep.mubr.msk.f32.mxu0 %vm780_vm11, %v2295_v58  ;;  %v2301_v37 = vmax.f32 %v2293_v34, 0.0  ;;  %v3094_v12 = vsel %vm283_vm12, 1.0, %v4188_v6  ;;  %v4126_v17 = vpack.c.bf16 %v2689_v13, %v2688_v60  ;;  %v2691_v22 = vld [vmem:[%s4942_s10 + $0x18] sm:$0xff] }
 0xbe8   :  { %3845 = vmatmul.mubr.msk.f32.vlgmr.msra.gmra.mrb[46].mxu0 %vm780_vm11, %v2296_v19  ;;  %v2302_v38 = vmax.f32 %v2294_v36, 0.0  ;;  %v4129_v23 = vpack.c.bf16 %v2691_v22, %v2690_v20 }
 0xbe9   :  { %3847 = vmatprep.mubr.msk.f32.mxu0 %vm780_vm11, %v2297_v53  ;;  %4127 = vmatpush3.bf16.msra.mxu0 %v4126_v17 }
 0xbea   :  { %4128 = vmatprep.subr.bf16.mxu0 %v4186_v3 }
 0xbec   :  { %3848 = vmatmul.mubr.msk.f32.gmra.mrb[48].mxu0 %vm780_vm11, %v2298_v16 }
 0xbed   :  { %3850 = vmatprep.mubr.msk.f32.mxu0 %vm780_vm11, %v2299_v24  ;;  %4130 = vmatpush3.bf16.msra.mxu0 %v4129_v23 }
 0xbee   :  { %4131 = vmatprep.subr.bf16.mxu0 %v4186_v3 }
 0xbf0   :  { %3851 = vmatmul.mubr.msk.f32.gmra.mrb[50].mxu0 %vm780_vm11, %v2300_v35  ;;  %v3213_v35 = vld [vmem:[%s4943_s11] ss:$0 sm:$0xff] }
 0xbf1   :  { %3853 = vmatprep.mubr.msk.f32.mxu0 %vm780_vm11, %v2301_v37 }
 0xbf4   :  { %3854 = vmatmul.mubr.msk.f32.gmra.mrb[52].mxu0 %vm780_vm11, %v2302_v38 }
 0xbf5   :  { %3893 = vmatprep.mubr.msk.f32.mxu0 %vm4187_vm0, %v4188_v6 }
 0xcbb   :  { %v3846_v40 = vpop.f32.mrb[46].mxu0 }
 0xcbc   :  { %v2412_v41 = vadd.f32 %v3846_v40, %v3201_v39  ;;  %v2406_v42 = vpop.f32.mrb[47].mxu0 }
 0xcbd   :  { %v2407_v43 = vadd.f32 %v3201_v39, %v2406_v42  ;;  %v2933_v42 = vld [vmem:[%s4944_s12 + $0x8] sm:$0xff] }
 0xcbe   :  { %v2446_v45 = vmax.f32 %v2412_v41, 0.0  ;;  %v2932_v41 = vld [vmem:[%s4944_s12] sm:$0xff] }
 0xcbf   :  { %v2445_v46 = vmax.f32 %v2407_v43, 0.0  ;;  %v3849_v47 = vpop.f32.mrb[48].mxu0  ;;  %v2934_v43 = vld [vmem:[%s4944_s12 + $0x10] sm:$0xff] }
 0xcc0   :  { %v2422_v48 = vadd.f32 %v3849_v47, %v3201_v39  ;;  %v2416_v49 = vpop.f32.mrb[49].mxu0 }
 0xcc1   :  { %v4114_v50 = vpack.c.bf16 %v2446_v45, %v2445_v46  ;;  %v2417_v2 = vadd.f32 %v3201_v39, %v2416_v49  ;;  %v4132_v45 = vpack.c.bf16 %v2933_v42, %v2932_v41 }
 0xcc2   :  { %v2448_v8 = vmax.f32 %v2422_v48, 0.0 }
 0xcc3   :  { %v2447_v9 = vmax.f32 %v2417_v2, 0.0  ;;  %v3852_v14 = vpop.f32.mrb[50].mxu0  ;;  %4115 = vmatpush3.bf16.msra.mxu1 %v4114_v50 }
 0xcc4   :  { %v2432_v15 = vadd.f32 %v3852_v14, %v3201_v39  ;;  %v2426_v0 = vpop.f32.mrb[51].mxu0  ;;  %4116 = vmatprep.subr.bf16.mxu1 %v4186_v3 }
 0xcc5   :  { %v4117_v56 = vpack.c.bf16 %v2448_v8, %v2447_v9  ;;  %v2427_v55 = vadd.f32 %v3201_v39, %v2426_v0 }
 0xcc6   :  { %v2450_v52 = vmax.f32 %v2432_v15, 0.0 }
 0xcc7   :  { %v2449_v57 = vmax.f32 %v2427_v55, 0.0  ;;  %v3855_v4 = vpop.f32.mrb[52].mxu0  ;;  %4118 = vmatpush3.bf16.msra.mxu1 %v4117_v56 }
 0xcc8   :  { %v2442_v54 = vadd.f32 %v3855_v4, %v3201_v39  ;;  %v2436_v63 = vpop.f32.mrb[53].mxu0  ;;  %4119 = vmatprep.subr.bf16.mxu1 %v4186_v3  ;;  %v3217_v4 = vld [vmem:[%s4945_s13] ss:$0 sm:$0xff]  ;;  %s3036_s13 = sshll.u32 %s4192_s23, 4  ;;  %s3037_s13 = int_to_ptr.vmem [resolvable:$true] %s3036_s13 }
 0xcc9   :  { %v4120_v10 = vpack.c.bf16 %v2450_v52, %v2449_v57  ;;  %v2437_v44 = vadd.f32 %v3201_v39, %v2436_v63  ;;  %s4162_s24 = scalar_lea.vmem %s3037_s13, 128  ;;  %p4167_p1 = scmp.lt.s32.totalorder %s3037_s13, %s3037_s13 }
 0xcca   :  { %v2452_v59 = vmax.f32 %v2442_v54, 0.0  ;;  %p4163_p0 = scmp.ne.s32.totalorder %s3037_s13, %s4162_s24  ;;  %p4168_p2 = scmp.lt.s32.totalorder %s4162_s24, %s4162_s24 }
 0xccb   :  { %v2451_v7 = vmax.f32 %v2437_v44, 0.0  ;;  %4121 = vmatpush3.bf16.msra.mxu1 %v4120_v10 }
 0xccc   :  { %4122 = vmatprep.subr.bf16.mxu1 %v4186_v3  ;;  %p4169_p3 = por %p4168_p2, %p4167_p1 }
 0xccd   :  { %v4123_v5 = vpack.c.bf16 %v2452_v59, %v2451_v7 }
 0xcce   :  { %p4170_p4 = pnand %p4169_p3, %p4163_p0 }
 0xccf   :  { %4124 = vmatpush3.bf16.msra.mxu1 %v4123_v5 }
 0xcd0   :  { %3875 = vmatprep.subr.mxu1 %v4188_v6 }
 0xcd2   :  { %3873 = vmatmul.mubr.msk.f32.vlgmr.msra.gmra.mrb[50].mxu1 %vm294_vm1, %v3094_v12 }
 0xcd3   :  { %3877 = vmatprep.mubr.msk.f32.mxu1 %vm4187_vm0, %v4188_v6 }
 0xda5   :  { %v2522_v1 = vpop.f32.mrb[50].mxu1 }
 0xda6   :  { %v2599_v61 = vmul.f32 %v2522_v1, %v2522_v1  ;;  %v3874_v51 = vpop.f32.mrb[51].mxu1  ;;  %3876 = vmatpush3.msra.mxu1 %v2522_v1 }
 0xda7   :  { %3878 = vmatmul.mubr.msk.f32.vlgmr.msra.gmra.mrb[52].mxu1 %vm2526_vm13, %v4190_v27  ;;  %3880 = vmatprep.subr.mxu1 %v4188_v6 }
 0xda8   :  { %3881 = vmatpush3.msra.mxu1 %v2599_v61  ;;  %3882 = vmatprep.mubr.msk.f32.mxu1 %vm4187_vm0, %v4188_v6 }
 0xda9   :  { %3896 = vmatprep.subr.mxu1 %v4188_v6 }
 0xdab   :  { %3883 = vmatmul.mubr.msk.f32.vlgmr.msra.gmra.mrb[54].mxu1 %vm2526_vm13, %v4190_v27 }
 0xdac   :  { %3898 = vmatprep.mubr.msk.f32.mxu1 %vm4187_vm0, %v4188_v6 }
 0xe7a   :  { %v2595_v25 = vpop.f32.mrb[52].mxu1 }
 0xe7b   :  { %v2670_v21 = vmul.f32 0.125, %v2595_v25  ;;  %v3879_v62 = vpop.f32.mrb[53].mxu1 }
 0xe7d   :  { %v2678_v29 = vrot.slane %v2670_v21, %v4454_v32  ;;  %v2672_v18 = vmul.f32 %v2670_v21, %v2670_v21 }
 0xe7e   :  { %v2666_v30 = vpop.f32.mrb[54].mxu1 }
 0xe7f   :  { %v2679_v31 = vsub.f32 %v2522_v1, %v2678_v29  ;;  %v2671_v58 = vmul.f32 0.125, %v2666_v30  ;;  %v3884_v19 = vpop.f32.mrb[55].mxu1 }
 0xe81   :  { %v2673_v26 = vsub.f32 %v2671_v58, %v2672_v18 }
 0xe83   :  { %v2674_v53 = vmax.f32 %v2673_v26, 0.0 }
 0xe85   :  { %v2680_v33 = vadd.f32 1e-05, %v2674_v53 }
 0xe87   :  { %4154 = vrsqrt.f32 %v2680_v33 }
 0xe91   :  { %v4155_v16 = vpop.eup %4154 }
 0xe92   :  { %v2685_v28 = vrot.slane %v4155_v16, %v4454_v32 }
 0xe94   :  { %v2686_v24 = vmul.f32 %v2685_v28, %v2679_v31 }
 0xe96   :  { %v2687_v34 = vadd.f32 0.0001, %v2686_v24 }
 0xe98   :  { %3894 = vmatmul.mubr.msk.f32.vlgmr.msra.gmra.mrb[54].mxu0 %vm780_vm11, %v2687_v34 }
 0xe99   :  { %3914 = vmatprep.mubr.msk.f32.mxu0 %vm4187_vm0, %v4188_v6  ;;  %4133 = vmatpush3.bf16.msra.mxu0 %v4132_v45 }
 0xe9a   :  { %4134 = vmatprep.subr.bf16.mxu0 %v4186_v3 }
 0xf6b   :  { %v2768_v36 = vpop.f32.mrb[54].mxu0 }
 0xf6c   :  { %v2769_v37 = vadd.f32 %v3213_v35, %v2768_v36  ;;  %v3895_v38 = vpop.f32.mrb[55].mxu0 }
 0xf6e   :  { %v2772_v39 = vmax.f32 %v2769_v37, 0.0 }
 0xf70   :  { %v2843_v40 = vmul.f32 %v2772_v39, %v2772_v39  ;;  %3897 = vmatpush3.msra.mxu1 %v2772_v39 }
 0xf71   :  { %3899 = vmatmul.mubr.msk.f32.vlgmr.msra.gmra.mrb[56].mxu1 %vm2526_vm13, %v4190_v27  ;;  %3901 = vmatprep.subr.mxu1 %v4188_v6 }
 0xf72   :  { %3902 = vmatpush3.msra.mxu1 %v2843_v40  ;;  %3903 = vmatprep.mubr.msk.f32.mxu1 %vm4187_vm0, %v4188_v6  ;;  %v2935_v6 = vld [vmem:[%s4944_s12 + $0x18] sm:$0xff] }
 0xf73   :  { %v4135_v46 = vpack.c.bf16 %v2935_v6, %v2934_v43 }
 0xf75   :  { %3904 = vmatmul.mubr.msk.f32.vlgmr.msra.gmra.mrb[58].mxu1 %vm2526_vm13, %v4190_v27  ;;  %4136 = vmatpush3.bf16.msra.mxu0 %v4135_v46 }
0x1044   :  { %v2839_v27 = vpop.f32.mrb[56].mxu1 }
0x1045   :  { %v2914_v47 = vmul.f32 0.125, %v2839_v27  ;;  %v3900_v48 = vpop.f32.mrb[57].mxu1 }
0x1047   :  { %v2916_v50 = vmul.f32 %v2914_v47, %v2914_v47  ;;  %v2922_v0 = vrot.slane %v2914_v47, %v4454_v32 }
0x1048   :  { %v2910_v49 = vpop.f32.mrb[58].mxu1 }
0x1049   :  { %v2915_v2 = vmul.f32 0.125, %v2910_v49  ;;  %v3905_v8 = vpop.f32.mrb[59].mxu1  ;;  %v2923_v55 = vsub.f32 %v2772_v39, %v2922_v0 }
0x104b   :  { %v2917_v9 = vsub.f32 %v2915_v2, %v2916_v50 }
0x104d   :  { %v2918_v14 = vmax.f32 %v2917_v9, 0.0 }
0x104f   :  { %v2924_v15 = vadd.f32 1e-05, %v2918_v14 }
0x1051   :  { %4156 = vrsqrt.f32 %v2924_v15 }
0x105b   :  { %v4157_v56 = vpop.eup %4156 }
0x105c   :  { %v2929_v52 = vrot.slane %v4157_v56, %v4454_v32 }
0x105e   :  { %v2930_v57 = vmul.f32 %v2929_v52, %v2923_v55 }
0x1060   :  { %v2931_v3 = vadd.f32 0.0001, %v2930_v57 }
0x1062   :  { %3915 = vmatmul.mubr.msk.f32.vlgmr.msra.gmra.mrb[56].mxu0 %vm780_vm11, %v2931_v3 }
0x1135   :  { %v3012_v54 = vpop.f32.mrb[56].mxu0 }
0x1136   :  { %v3013_v63 = vadd.f32 %v3217_v4, %v3012_v54  ;;  %v3916_v10 = vpop.f32.mrb[57].mxu0 }
0x1138   :  { %v3016_v44 = vsel %vm2526_vm13, %v3013_v63, -inf }
0x1139   :  { %3017 = vmax.xlane.f32.xlu0 %v3016_v44 }
0x11c6   :  { %v3018_v11 = vpop.xlane.xlu0 %3017 }
0x11c7   :  { %v3019_v59 = vsub.f32 %v3013_v63, %v3018_v11 }
0x11c9   :  { %v3020_v7 = vmul.f32 1.442695, %v3019_v59 }
0x11cb   :  { %4158 = vpow2.f32 %v3020_v7 }
0x11d5   :  { %v4159_v5 = vpop.eup %4158 }
0x11d6   :  { %v3022_v32 = vsel %vm2526_vm13, %v4159_v5, 0.0 }
0x11d7   :  { %3023 = vadd.xlane.f32.xlu1 %v3022_v32 }
0x1264   :  { %v3024_v12 = vpop.xlane.xlu1 %3023 }
0x1265   :  { %4160 = vlog2.f32 %v3024_v12 }
0x126f   :  { %v4161_v1 = vpop.eup %4160 }
0x1270   :  { %v3026_v61 = vmul.f32 0.6931472, %v4161_v1 }
0x1272   :  { %v3027_v51 = vadd.f32 %v3026_v61, %v3018_v11 }
0x1274   :  { %v3028_v60 = vsub.f32 %v3013_v63, %v3027_v51 }
0x1276   :  { %3029 = vst.msk [vmem:[#allocation2] sm:$0xff] %vm2526_vm13, %v3028_v60 }
0x1277   :  { %4173 = shalt.err (!%p4170_p4)
}
0x1278   :  { %s4174_s27 = scalar_lea.hbm %s4946_s14, 128 }
0x1279   :  { %p4175_p5 = scmp.ne.s32.totalorder %s4946_s14, %s4174_s27  ;;  %p4178_p6 = scmp.lt.u32.totalorder %s4174_s27, %s4946_s14 }
0x127b   :  { %p4180_p7 = pnand %p4178_p6, %p4175_p5 }
0x127d   :  { %4183 = shalt.err (!%p4180_p7)
}
0x127e   :  { %3039 = dma.vmem_to_hbm [thread:$0]  %s3037_s13, 128, %s4946_s14, [#allocation3]  }
0x127f   :  { %4184 = dma.done.wait [#allocation3], 128  }
0x1280   :  { %4185 = vsyncadd [#allocation3], 4294967168 }
0x1281   :  { %3043 = vsyncpa [#allocation3], 1 }

</bundles_post_ra>
